<compile_context>
chip_gen: v7x
topology: tpu7x:2x2x1
jax: 0.10.0
libtpu: 0.0.40
codegen_flags: <defaults>
</compile_context>

<pallas_src>
import math
from functools import partial

import jax
import jax.numpy as jnp
from jax.experimental import pallas as pl
from jax.experimental.pallas import tpu as pltpu

# ---------------------------------------------------------------------------
# Problem sizes (vector-obs branch of the module)
# ---------------------------------------------------------------------------
BATCH = 2
OBS_DIM = 16          # flattened observation dim
HIDDEN = 64           # net_arch pi/vf hidden sizes
ACT_DIM = 4           # Box action dimension
LOG_STD_INIT = 0.0

FUSED = 2 * HIDDEN    # pi & vf latents packed side by side -> 128 lanes
OUT_W = 8             # packed output: [actions(4) | value(1) | logp(1) | pad(2)]
_LOG_2PI = math.log(2.0 * math.pi)


# ---------------------------------------------------------------------------
# Pallas kernel: fused actor-critic forward for one batch tile
# ---------------------------------------------------------------------------
def _policy_kernel(obs_ref, eps_ref, w1_ref, w2_ref, w3_ref, b12_ref, hslab_ref,
                   out_ref, *, compute_dtype):
    x = obs_ref[...].astype(compute_dtype)                      # (TB, OBS_DIM)

    # fused pi|vf MLP: tanh(tanh(x W1 + b1) W2 + b2), 128-lane dense
    h1 = jnp.tanh(
        jnp.dot(x, w1_ref[...].astype(compute_dtype),
                preferred_element_type=jnp.float32) + b12_ref[0:1, :])
    h2 = jnp.tanh(
        jnp.dot(h1.astype(compute_dtype), w2_ref[...].astype(compute_dtype),
                preferred_element_type=jnp.float32) + b12_ref[1:2, :])

    # fused heads: lanes [0,4) = action mean, lane 4 = value, lanes 5..7 = 0
    head = (jnp.dot(h2.astype(compute_dtype), w3_ref[...].astype(compute_dtype),
                    preferred_element_type=jnp.float32) + hslab_ref[0:1, :])

    log_std = hslab_ref[1:2, :]        # (1, OUT_W); lanes >= ACT_DIM are zero
    eps = eps_ref[...]                 # (TB, OUT_W); lanes >= ACT_DIM are zero
    lane = jax.lax.broadcasted_iota(jnp.int32, out_ref.shape, 1)

    # actions in lanes [0,ACT_DIM); lane ACT_DIM keeps the value (eps=0 there);
    # remaining lanes stay exactly 0.
    act_val = head + jnp.exp(log_std) * eps

    # DiagGaussian log-prob: (actions-mean)/std == eps exactly.
    elem = jnp.where(lane < ACT_DIM,
                     -0.5 * eps * eps - log_std - 0.5 * _LOG_2PI,
                     0.0)
    logp = jnp.sum(elem, axis=-1, keepdims=True)                # (TB, 1)

    # single packed store: [actions | value | logp | pad]
    out_ref[...] = jnp.where(lane == ACT_DIM + 1, logp, act_val)


# ---------------------------------------------------------------------------
# Wrapper: batch-gridded pallas_call, weights VMEM-resident across the grid
# ---------------------------------------------------------------------------
def actor_critic_forward(obs, packed, noise, *, tile_b=256,
                         compute_dtype=jnp.float32):
    """obs: (B, OBS_DIM) f32, noise: (B, ACT_DIM) standard-normal eps."""
    B = obs.shape[0]
    n_blocks = pl.cdiv(B, tile_b)
    Bp = n_blocks * tile_b

    obs_p = jnp.pad(obs, ((0, Bp - B), (0, 0)))
    eps_p = jnp.pad(noise, ((0, Bp - B), (0, OUT_W - ACT_DIM)))  # zero-pad lanes

    const = lambda i: (0, 0)
    out = pl.pallas_call(
        partial(_policy_kernel, compute_dtype=compute_dtype),
        out_shape=jax.ShapeDtypeStruct((Bp, OUT_W), jnp.float32),
        grid_spec=pltpu.PrefetchScalarGridSpec(
            num_scalar_prefetch=0,
            grid=(n_blocks,),
            in_specs=[
                pl.BlockSpec((tile_b, OBS_DIM), lambda i: (i, 0)),   # obs
                pl.BlockSpec((tile_b, OUT_W), lambda i: (i, 0)),     # eps
                pl.BlockSpec((OBS_DIM, FUSED), const),               # W1 = [w1p|w1v]
                pl.BlockSpec((FUSED, FUSED), const),                 # W2 = blkdiag
                pl.BlockSpec((FUSED, OUT_W), const),                 # W3 = heads
                pl.BlockSpec((2, FUSED), const),                     # [b1; b2]
                pl.BlockSpec((2, OUT_W), const),                     # [b3; log_std]
            ],
            out_specs=pl.BlockSpec((tile_b, OUT_W), lambda i: (i, 0)),
        ),
        compiler_params=pltpu.CompilerParams(
            dimension_semantics=("parallel",)),
    )(obs_p, eps_p, packed["w1"], packed["w2"], packed["w3"],
      packed["b12"], packed["hslab"])

    actions = out[:B, :ACT_DIM]
    values = out[:B, ACT_DIM:ACT_DIM + 1]
    log_prob = out[:B, ACT_DIM + 1]            # (B,), matches torch's log_prob
    return actions, values, log_prob


# ---------------------------------------------------------------------------
# Parameter construction (orthogonal init, as in the module) + packing
# ---------------------------------------------------------------------------
def _orthogonal(key, shape, gain):
    # shape = (in_dim, out_dim); orthogonal columns scaled by gain.
    return gain * jax.nn.initializers.orthogonal(column_axis=-1)(key, shape, jnp.float32)


def make_params(key):
    ks = jax.random.split(key, 6)
    g = math.sqrt(2.0)
    return {
        "w1p": _orthogonal(ks[0], (OBS_DIM, HIDDEN), g),
        "b1p": jnp.zeros((1, HIDDEN), jnp.float32),
        "w2p": _orthogonal(ks[1], (HIDDEN, HIDDEN), g),
        "b2p": jnp.zeros((1, HIDDEN), jnp.float32),
        "w1v": _orthogonal(ks[2], (OBS_DIM, HIDDEN), g),
        "b1v": jnp.zeros((1, HIDDEN), jnp.float32),
        "w2v": _orthogonal(ks[3], (HIDDEN, HIDDEN), g),
        "b2v": jnp.zeros((1, HIDDEN), jnp.float32),
        "wa": _orthogonal(ks[4], (HIDDEN, ACT_DIM), 0.01),
        "ba": jnp.zeros((1, ACT_DIM), jnp.float32),
        "wv": _orthogonal(ks[5], (HIDDEN, 1), 1.0),
        "bv": jnp.zeros((1, 1), jnp.float32),
        "log_std": jnp.full((1, ACT_DIM), LOG_STD_INIT, jnp.float32),
    }


def pack_params(p):
    """Fuse pi/vf branches into lane-dense weight slabs for the kernel."""
    w1 = jnp.concatenate([p["w1p"], p["w1v"]], axis=1)                    # (16, 128)
    w2 = jnp.zeros((FUSED, FUSED), jnp.float32)
    w2 = w2.at[:HIDDEN, :HIDDEN].set(p["w2p"]).at[HIDDEN:, HIDDEN:].set(p["w2v"])
    w3 = jnp.zeros((FUSED, OUT_W), jnp.float32)
    w3 = w3.at[:HIDDEN, :ACT_DIM].set(p["wa"])
    w3 = w3.at[HIDDEN:, ACT_DIM:ACT_DIM + 1].set(p["wv"])
    b12 = jnp.stack([jnp.concatenate([p["b1p"][0], p["b1v"][0]]),
                     jnp.concatenate([p["b2p"][0], p["b2v"][0]])])        # (2, 128)
    hb = jnp.zeros((OUT_W,), jnp.float32)
    hb = hb.at[:ACT_DIM].set(p["ba"][0]).at[ACT_DIM].set(p["bv"][0, 0])
    ls = jnp.zeros((OUT_W,), jnp.float32).at[:ACT_DIM].set(p["log_std"][0])
    hslab = jnp.stack([hb, ls])                                           # (2, 8)
    return dict(w1=w1, w2=w2, w3=w3, b12=b12, hslab=hslab)


# ---------------------------------------------------------------------------
# Pure-JAX reference (unfused, mirrors the PyTorch forward)
# ---------------------------------------------------------------------------
def reference_forward(obs, p, noise):
    h2p = jnp.tanh(jnp.tanh(obs @ p["w1p"] + p["b1p"]) @ p["w2p"] + p["b2p"])
    h2v = jnp.tanh(jnp.tanh(obs @ p["w1v"] + p["b1v"]) @ p["w2v"] + p["b2v"])
    mean = h2p @ p["wa"] + p["ba"]
    values = h2v @ p["wv"] + p["bv"]
    std = jnp.exp(p["log_std"])
    actions = mean + std * noise
    logp = jnp.sum(
        -0.5 * ((actions - mean) / std) ** 2 - p["log_std"] - 0.5 * jnp.log(2 * jnp.pi),
        axis=-1,
    )
    return actions, values, logp


if __name__ == "__main__":
    key = jax.random.PRNGKey(0)
    k_obs, k_par, k_eps = jax.random.split(key, 3)

    obs = jax.random.normal(k_obs, (BATCH, OBS_DIM), jnp.float32)
    params = make_params(k_par)
    packed = pack_params(params)
    noise = jax.random.normal(k_eps, (BATCH, ACT_DIM), jnp.float32)
    # TODO(synk): deterministic=True path = noise of zeros (actions == mean);
    #             optionally generate eps in-kernel with pltpu.prng_random_bits.

    actions, values, log_prob = actor_critic_forward(obs, packed, noise)
    jax.block_until_ready((actions, values, log_prob))

    ra, rv, rl = reference_forward(obs, params, noise)
    assert jnp.allclose(actions, ra, atol=1e-5), "actions mismatch"
    assert jnp.allclose(values, rv, atol=1e-5), "values mismatch"
    assert jnp.allclose(log_prob, rl, atol=1e-5), "log_prob mismatch"

    print("KERNEL_OK")
</pallas_src>

<mosaic_0001>
module attributes {stable_mosaic.version = 11 : i64} {
  func.func @_policy_kernel(%arg0: i32, %arg1: memref<256x16xf32, #tpu.memory_space<vmem>>, %arg2: memref<256x8xf32, #tpu.memory_space<vmem>>, %arg3: memref<16x128xf32, #tpu.memory_space<vmem>>, %arg4: memref<128x128xf32, #tpu.memory_space<vmem>>, %arg5: memref<128x8xf32, #tpu.memory_space<vmem>>, %arg6: memref<2x128xf32, #tpu.memory_space<vmem>>, %arg7: memref<2x8xf32, #tpu.memory_space<vmem>>, %arg8: memref<256x8xf32, #tpu.memory_space<vmem>>) attributes {dimension_semantics = [#tpu.dimension_semantics<parallel>], iteration_bounds = array<i64: 1>, scalar_prefetch = 0 : i64, scratch_operands = 0 : i64, tpu.core_type = #tpu.core_type<tc>, window_params = [{transform_indices = @transform_0, window_bounds = array<i64: 256, 16>}, {transform_indices = @transform_1, window_bounds = array<i64: 256, 8>}, {pipeline_mode = #tpu.pipeline_mode<synchronous>, transform_indices = @transform_2, window_bounds = array<i64: 16, 128>}, {pipeline_mode = #tpu.pipeline_mode<synchronous>, transform_indices = @transform_3, window_bounds = array<i64: 128, 128>}, {pipeline_mode = #tpu.pipeline_mode<synchronous>, transform_indices = @transform_4, window_bounds = array<i64: 128, 8>}, {pipeline_mode = #tpu.pipeline_mode<synchronous>, transform_indices = @transform_5, window_bounds = array<i64: 2, 128>}, {pipeline_mode = #tpu.pipeline_mode<synchronous>, transform_indices = @transform_6, window_bounds = array<i64: 2, 8>}, {transform_indices = @transform_7, window_bounds = array<i64: 256, 8>}]} {
    %c0 = arith.constant 0 : index
    %c0_0 = arith.constant 0 : index
    %0 = vector.load %arg1[%c0, %c0_0] : memref<256x16xf32, #tpu.memory_space<vmem>>, vector<256x16xf32>
    %c0_1 = arith.constant 0 : index
    %c0_2 = arith.constant 0 : index
    %1 = vector.load %arg3[%c0_1, %c0_2] : memref<16x128xf32, #tpu.memory_space<vmem>>, vector<16x128xf32>
    %cst = arith.constant dense<0.000000e+00> : vector<256x128xf32>
    %2 = tpu.matmul %0, %1, %cst {dimension_numbers = #tpu.dot_dimension_numbers<[1], [0], [0], [1], [0, 0, 1, 1], [], []>} : vector<256x16xf32>, vector<16x128xf32>, vector<256x128xf32> -> vector<256x128xf32>
    %c0_3 = arith.constant 0 : index
    %c0_4 = arith.constant 0 : index
    %3 = vector.load %arg6[%c0_3, %c0_4] : memref<2x128xf32, #tpu.memory_space<vmem>>, vector<1x128xf32>
    %4 = vector.broadcast %3 : vector<1x128xf32> to vector<256x128xf32>
    %5 = arith.addf %2, %4 : vector<256x128xf32>
    %6 = math.tanh %5 : vector<256x128xf32>
    %c0_5 = arith.constant 0 : index
    %c0_6 = arith.constant 0 : index
    %7 = vector.load %arg4[%c0_5, %c0_6] : memref<128x128xf32, #tpu.memory_space<vmem>>, vector<128x128xf32>
    %cst_7 = arith.constant dense<0.000000e+00> : vector<256x128xf32>
    %8 = tpu.matmul %6, %7, %cst_7 {dimension_numbers = #tpu.dot_dimension_numbers<[1], [0], [0], [1], [0, 0, 1, 1], [], []>} : vector<256x128xf32>, vector<128x128xf32>, vector<256x128xf32> -> vector<256x128xf32>
    %c1 = arith.constant 1 : index
    %c0_8 = arith.constant 0 : index
    %9 = vector.load %arg6[%c1, %c0_8] : memref<2x128xf32, #tpu.memory_space<vmem>>, vector<1x128xf32>
    %10 = vector.broadcast %9 : vector<1x128xf32> to vector<256x128xf32>
    %11 = arith.addf %8, %10 : vector<256x128xf32>
    %12 = math.tanh %11 : vector<256x128xf32>
    %c0_9 = arith.constant 0 : index
    %c0_10 = arith.constant 0 : index
    %13 = vector.load %arg5[%c0_9, %c0_10] : memref<128x8xf32, #tpu.memory_space<vmem>>, vector<128x8xf32>
    %cst_11 = arith.constant dense<0.000000e+00> : vector<256x8xf32>
    %14 = tpu.matmul %12, %13, %cst_11 {dimension_numbers = #tpu.dot_dimension_numbers<[1], [0], [0], [1], [0, 0, 1, 1], [], []>} : vector<256x128xf32>, vector<128x8xf32>, vector<256x8xf32> -> vector<256x8xf32>
    %c0_12 = arith.constant 0 : index
    %c0_13 = arith.constant 0 : index
    %15 = vector.load %arg7[%c0_12, %c0_13] : memref<2x8xf32, #tpu.memory_space<vmem>>, vector<1x8xf32>
    %16 = vector.broadcast %15 : vector<1x8xf32> to vector<256x8xf32>
    %17 = arith.addf %14, %16 : vector<256x8xf32>
    %c1_14 = arith.constant 1 : index
    %c0_15 = arith.constant 0 : index
    %18 = vector.load %arg7[%c1_14, %c0_15] : memref<2x8xf32, #tpu.memory_space<vmem>>, vector<1x8xf32>
    %c0_16 = arith.constant 0 : index
    %c0_17 = arith.constant 0 : index
    %19 = vector.load %arg2[%c0_16, %c0_17] : memref<256x8xf32, #tpu.memory_space<vmem>>, vector<256x8xf32>
    %20 = tpu.iota {dimensions = array<i32: 1>} : vector<256x8xi32>
    %21 = math.exp %18 : vector<1x8xf32>
    %22 = vector.broadcast %21 : vector<1x8xf32> to vector<256x8xf32>
    %23 = arith.mulf %22, %19 : vector<256x8xf32>
    %24 = arith.addf %17, %23 : vector<256x8xf32>
    %c4_i32 = arith.constant 4 : i32
    %25 = vector.broadcast %c4_i32 : i32 to vector<256x8xi32>
    %26 = arith.cmpi slt, %20, %25 : vector<256x8xi32>
    %cst_18 = arith.constant -5.000000e-01 : f32
    %27 = vector.broadcast %cst_18 : f32 to vector<256x8xf32>
    %28 = arith.mulf %27, %19 : vector<256x8xf32>
    %29 = arith.mulf %28, %19 : vector<256x8xf32>
    %30 = vector.broadcast %18 : vector<1x8xf32> to vector<256x8xf32>
    %31 = arith.subf %29, %30 : vector<256x8xf32>
    %cst_19 = arith.constant 0.918938517 : f32
    %32 = vector.broadcast %cst_19 : f32 to vector<256x8xf32>
    %33 = arith.subf %31, %32 : vector<256x8xf32>
    %cst_20 = arith.constant 0.000000e+00 : f32
    %34 = vector.broadcast %cst_20 : f32 to vector<256x8xf32>
    %35 = arith.select %26, %33, %34 : vector<256x8xi1>, vector<256x8xf32>
    %cst_21 = arith.constant dense<0.000000e+00> : vector<256xf32>
    %36 = vector.multi_reduction <add>, %35, %cst_21 [1] : vector<256x8xf32> to vector<256xf32>
    %37 = vector.shape_cast %36 : vector<256xf32> to vector<256x1xf32>
    %c5_i32 = arith.constant 5 : i32
    %38 = vector.broadcast %c5_i32 : i32 to vector<256x8xi32>
    %39 = arith.cmpi eq, %20, %38 : vector<256x8xi32>
    %40 = vector.shape_cast %37 : vector<256x1xf32> to vector<256x1xf32>
    %41 = vector.broadcast %40 : vector<256x1xf32> to vector<256x8xf32>
    %42 = arith.select %39, %41, %24 : vector<256x8xi1>, vector<256x8xf32>
    %c0_22 = arith.constant 0 : index
    %c0_23 = arith.constant 0 : index
    %43 = vector.load %arg8[%c0_22, %c0_23] : memref<256x8xf32, #tpu.memory_space<vmem>>, vector<256x8xf32>
    tpu.vector_store %arg8[%c0_22, %c0_23], %42 {strides = array<i32>} : memref<256x8xf32, #tpu.memory_space<vmem>>, vector<256x8xf32>,
    return
  }
  func.func @transform_0(%arg0: i32) -> (i32, i32) {
    %c0_i32 = arith.constant 0 : i32
    %c0_i32_0 = arith.constant 0 : i32
    return %arg0, %c0_i32 : i32, i32
  }
  func.func @transform_1(%arg0: i32) -> (i32, i32) {
    %c0_i32 = arith.constant 0 : i32
    %c0_i32_0 = arith.constant 0 : i32
    return %arg0, %c0_i32 : i32, i32
  }
  func.func @transform_2(%arg0: i32) -> (i32, i32) {
    %c0_i32 = arith.constant 0 : i32
    %c0_i32_0 = arith.constant 0 : i32
    %c0_i32_1 = arith.constant 0 : i32
    return %c0_i32, %c0_i32_0 : i32, i32
  }
  func.func @transform_3(%arg0: i32) -> (i32, i32) {
    %c0_i32 = arith.constant 0 : i32
    %c0_i32_0 = arith.constant 0 : i32
    %c0_i32_1 = arith.constant 0 : i32
    return %c0_i32, %c0_i32_0 : i32, i32
  }
  func.func @transform_4(%arg0: i32) -> (i32, i32) {
    %c0_i32 = arith.constant 0 : i32
    %c0_i32_0 = arith.constant 0 : i32
    %c0_i32_1 = arith.constant 0 : i32
    return %c0_i32, %c0_i32_0 : i32, i32
  }
  func.func @transform_5(%arg0: i32) -> (i32, i32) {
    %c0_i32 = arith.constant 0 : i32
    %c0_i32_0 = arith.constant 0 : i32
    %c0_i32_1 = arith.constant 0 : i32
    return %c0_i32, %c0_i32_0 : i32, i32
  }
  func.func @transform_6(%arg0: i32) -> (i32, i32) {
    %c0_i32 = arith.constant 0 : i32
    %c0_i32_0 = arith.constant 0 : i32
    %c0_i32_1 = arith.constant 0 : i32
    return %c0_i32, %c0_i32_0 : i32, i32
  }
  func.func @transform_7(%arg0: i32) -> (i32, i32) {
    %c0_i32 = arith.constant 0 : i32
    %c0_i32_0 = arith.constant 0 : i32
    return %arg0, %c0_i32 : i32, i32
  }
}

</mosaic_0001>

<bundles_post_ra>
// kernel: tpu_custom_call.1
= control target key start
LH: loop header
LB: loop body
LE: loop exit
PB: predicated region body
PF: predicated region fallthrough
CT: control target
= control target key end

     0   :  { %vm65_vm0 = vcmask 130048   ;;  %vm1213_vm1 = vcmask 64512   ;;  %s3061_s2 = inlined_call_operand.vmem [shape: f32[16,128], index: 2, kind: input, shape index: {}]   ;;  %s3062_s0 = inlined_call_operand.vmem [shape: f32[256,16], index: 0, kind: input, shape index: {}]   ;;  %s3063_s3 = inlined_call_operand.vmem [shape: f32[128,128], index: 3, kind: input, shape index: {}]   ;;  %s3064_s4 = inlined_call_operand.vmem [shape: f32[128,8], index: 4, kind: input, shape index: {}]   ;;  %s3065_s5 = inlined_call_operand.vmem [shape: f32[2,128], index: 5, kind: input, shape index: {}]   ;;  %s3066_s1 = inlined_call_operand.vmem [shape: f32[256,8], index: 1, kind: input, shape index: {}]   ;;  %s3067_s6 = inlined_call_operand.vmem [shape: f32[2,8], index: 6, kind: input, shape index: {}]   ;;  %s3068_s7 = inlined_call_operand.vmem [shape: f32[256,8], index: 7, kind: output, shape index: {}]  }
   0x1   :  { %v58_v0 = vld [vmem:[%s3061_s2] sm:$0xff]  ;;  %v59_v1 = vld [vmem:[%s3061_s2 + $0x8] sm:$0xff]  ;;  %v28_v5 = vld [vmem:[%s3062_s0 + $0x10] sm:$0xff] }
   0x2   :  { %v26_v2 = vld [vmem:[%s3062_s0] sm:$0xff]  ;;  %v1788_v3 = vpack.c.bf16 %v59_v1, %v58_v0  ;;  %v27_v4 = vld [vmem:[%s3062_s0 + $0x8] sm:$0xff]  ;;  %v44_v8 = vld [vmem:[%s3062_s0 + $0x90] sm:$0xff] }
   0x3   :  { %1580 = vmatprep.mubr.msk.f32.mxu0 %vm65_vm0, %v26_v2  ;;  %v42_v6 = vld [vmem:[%s3062_s0 + $0x80] sm:$0xff]  ;;  %v43_v7 = vld [vmem:[%s3062_s0 + $0x88] sm:$0xff]  ;;  %v29_v9 = vld [vmem:[%s3062_s0 + $0x18] sm:$0xff] }
   0x4   :  { %1789 = vmatprep.subr.bf16.mxu0 %v1788_v3  ;;  %1856 = vmatprep.subr.bf16.mxu1 %v1788_v3  ;;  %v30_v10 = vld [vmem:[%s3062_s0 + $0x20] sm:$0xff]  ;;  %v45_v11 = vld [vmem:[%s3062_s0 + $0x98] sm:$0xff]  ;;  %v420_v14 = vld [vmem:[%s3063_s3 + $0x8] sm:$0xff] }
   0x5   :  { %1791 = vmatpush3.bf16.msra.mxu0 %v1788_v3  ;;  %1857 = vmatpush3.bf16.msra.mxu1 %v1788_v3  ;;  %v46_v12 = vld [vmem:[%s3062_s0 + $0xa0] sm:$0xff]  ;;  %v31_v15 = vld [vmem:[%s3062_s0 + $0x28] sm:$0xff]  ;;  %v421_v17 = vld [vmem:[%s3063_s3 + $0x10] sm:$0xff] }
   0x6   :  { %1604 = vmatprep.mubr.msk.f32.mxu1 %vm65_vm0, %v42_v6  ;;  %v419_v13 = vld [vmem:[%s3063_s3] sm:$0xff]  ;;  %v422_v18 = vld [vmem:[%s3063_s3 + $0x18] sm:$0xff]  ;;  %v32_v19 = vld [vmem:[%s3062_s0 + $0x30] sm:$0xff] }
   0x7   :  { %v1792_v16 = vpack.c.bf16 %v420_v14, %v419_v13  ;;  %v47_v20 = vld [vmem:[%s3062_s0 + $0xa8] sm:$0xff]  ;;  %v1796_v21 = vpack.c.bf16 %v422_v18, %v421_v17  ;;  %v48_v22 = vld [vmem:[%s3062_s0 + $0xb0] sm:$0xff]  ;;  %v423_v23 = vld [vmem:[%s3063_s3 + $0x20] sm:$0xff] }
   0x8   :  { %1581 = vmatmul.mubr.msk.f32.vlgmr.msra.gmra.mrb[0].mxu0 %vm65_vm0, %v27_v4  ;;  %1605 = vmatmul.mubr.msk.f32.vlgmr.msra.gmra.mrb[0].mxu1 %vm65_vm0, %v43_v7  ;;  %v424_v24 = vld [vmem:[%s3063_s3 + $0x28] sm:$0xff]  ;;  %v33_v25 = vld [vmem:[%s3062_s0 + $0x38] sm:$0xff]  ;;  %v34_v26 = vld [vmem:[%s3062_s0 + $0x40] sm:$0xff] }
   0x9   :  { %1583 = vmatprep.mubr.msk.f32.mxu0 %vm65_vm0, %v28_v5  ;;  %1607 = vmatprep.mubr.msk.f32.mxu1 %vm65_vm0, %v44_v8  ;;  %v49_v27 = vld [vmem:[%s3062_s0 + $0xb8] sm:$0xff]  ;;  %v1800_v28 = vpack.c.bf16 %v424_v24, %v423_v23  ;;  %v50_v29 = vld [vmem:[%s3062_s0 + $0xc0] sm:$0xff]  ;;  %v425_v30 = vld [vmem:[%s3063_s3 + $0x30] sm:$0xff] }
   0xa   :  { %1793 = vmatprep.subr.bf16.mxu1 %v1792_v16  ;;  %v426_v31 = vld [vmem:[%s3063_s3 + $0x38] sm:$0xff]  ;;  %v35_v32 = vld [vmem:[%s3062_s0 + $0x48] sm:$0xff]  ;;  %v36_v33 = vld [vmem:[%s3062_s0 + $0x50] sm:$0xff] }
   0xb   :  { %1795 = vmatpush3.bf16.msra.mxu1 %v1792_v16  ;;  %v51_v34 = vld [vmem:[%s3062_s0 + $0xc8] sm:$0xff]  ;;  %v1804_v35 = vpack.c.bf16 %v426_v31, %v425_v30  ;;  %v52_v36 = vld [vmem:[%s3062_s0 + $0xd0] sm:$0xff]  ;;  %v427_v37 = vld [vmem:[%s3063_s3 + $0x40] sm:$0xff] }
   0xc   :  { %1584 = vmatmul.mubr.msk.f32.gmra.mrb[2].mxu0 %vm65_vm0, %v29_v9  ;;  %1608 = vmatmul.mubr.msk.f32.gmra.mrb[2].mxu1 %vm65_vm0, %v45_v11  ;;  %v428_v38 = vld [vmem:[%s3063_s3 + $0x48] sm:$0xff]  ;;  %v37_v39 = vld [vmem:[%s3062_s0 + $0x58] sm:$0xff]  ;;  %v38_v40 = vld [vmem:[%s3062_s0 + $0x60] sm:$0xff] }
   0xd   :  { %1586 = vmatprep.mubr.msk.f32.mxu0 %vm65_vm0, %v30_v10  ;;  %1610 = vmatprep.mubr.msk.f32.mxu1 %vm65_vm0, %v46_v12  ;;  %v53_v41 = vld [vmem:[%s3062_s0 + $0xd8] sm:$0xff]  ;;  %v1808_v42 = vpack.c.bf16 %v428_v38, %v427_v37  ;;  %v54_v43 = vld [vmem:[%s3062_s0 + $0xe0] sm:$0xff]  ;;  %v39_v44 = vld [vmem:[%s3062_s0 + $0x68] sm:$0xff] }
   0xe   :  { %1797 = vmatprep.subr.bf16.mxu1 %v1796_v21  ;;  %v40_v45 = vld [vmem:[%s3062_s0 + $0x70] sm:$0xff]  ;;  %v55_v46 = vld [vmem:[%s3062_s0 + $0xe8] sm:$0xff]  ;;  %v41_v48 = vld [vmem:[%s3062_s0 + $0x78] sm:$0xff] }
   0xf   :  { %1799 = vmatpush3.bf16.msra.mxu1 %v1796_v21  ;;  %v56_v47 = vld [vmem:[%s3062_s0 + $0xf0] sm:$0xff]  ;;  %v57_v49 = vld [vmem:[%s3062_s0 + $0xf8] sm:$0xff]  ;;  %v431_v53 = vld [vmem:[%s3063_s3 + $0x60] sm:$0xff] }
  0x10   :  { %1587 = vmatmul.mubr.msk.f32.gmra.mrb[4].mxu0 %vm65_vm0, %v31_v15  ;;  %1611 = vmatmul.mubr.msk.f32.gmra.mrb[4].mxu1 %vm65_vm0, %v47_v20  ;;  %v429_v50 = vld [vmem:[%s3063_s3 + $0x50] sm:$0xff]  ;;  %v430_v51 = vld [vmem:[%s3063_s3 + $0x58] sm:$0xff]  ;;  %v432_v54 = vld [vmem:[%s3063_s3 + $0x68] sm:$0xff] }
  0x11   :  { %1589 = vmatprep.mubr.msk.f32.mxu0 %vm65_vm0, %v32_v19  ;;  %1613 = vmatprep.mubr.msk.f32.mxu1 %vm65_vm0, %v48_v22  ;;  %v1812_v52 = vpack.c.bf16 %v430_v51, %v429_v50  ;;  %v1816_v55 = vpack.c.bf16 %v432_v54, %v431_v53  ;;  %v433_v56 = vld [vmem:[%s3063_s3 + $0x70] sm:$0xff]  ;;  %v434_v57 = vld [vmem:[%s3063_s3 + $0x78] sm:$0xff]  ;;  %v697_v59 = vld [vmem:[%s3064_s4] sm:$0xff] }
  0x12   :  { %1801 = vmatprep.subr.bf16.mxu1 %v1800_v28  ;;  %v1820_v58 = vpack.c.bf16 %v434_v57, %v433_v56  ;;  %v698_v60 = vld [vmem:[%s3064_s4 + $0x8] sm:$0xff]  ;;  %v699_v61 = vld [vmem:[%s3064_s4 + $0x10] sm:$0xff]  ;;  %v700_v63 = vld [vmem:[%s3064_s4 + $0x18] sm:$0xff] }
  0x13   :  { %1803 = vmatpush3.bf16.msra.mxu1 %v1800_v28  ;;  %v1824_v62 = vpack.c.bf16 %v698_v60, %v697_v59  ;;  %v1828_v0 = vpack.c.bf16 %v700_v63, %v699_v61  ;;  %v701_v1 = vld [vmem:[%s3064_s4 + $0x20] sm:$0xff]  ;;  %v702_v2 = vld [vmem:[%s3064_s4 + $0x28] sm:$0xff]  ;;  %v703_v4 = vld [vmem:[%s3064_s4 + $0x30] sm:$0xff] }
  0x14   :  { %1590 = vmatmul.mubr.msk.f32.gmra.mrb[6].mxu0 %vm65_vm0, %v33_v25  ;;  %1614 = vmatmul.mubr.msk.f32.gmra.mrb[6].mxu1 %vm65_vm0, %v49_v27  ;;  %v1832_v3 = vpack.c.bf16 %v702_v2, %v701_v1  ;;  %v704_v5 = vld [vmem:[%s3064_s4 + $0x38] sm:$0xff]  ;;  %v705_v7 = vld [vmem:[%s3064_s4 + $0x40] sm:$0xff]  ;;  %v706_v8 = vld [vmem:[%s3064_s4 + $0x48] sm:$0xff] }
  0x15   :  { %1592 = vmatprep.mubr.msk.f32.mxu0 %vm65_vm0, %v34_v26  ;;  %1616 = vmatprep.mubr.msk.f32.mxu1 %vm65_vm0, %v50_v29  ;;  %v1836_v6 = vpack.c.bf16 %v704_v5, %v703_v4  ;;  %v1840_v9 = vpack.c.bf16 %v706_v8, %v705_v7  ;;  %v2243_v10 = vld [vmem:[%s3065_s5] ss:$0 sm:$0xff] }
  0x16   :  { %1805 = vmatprep.subr.bf16.mxu1 %v1804_v35  ;;  %1825 = vmatprep.subr.bf16.mxu0 %v1824_v62 }
  0x17   :  { %1807 = vmatpush3.bf16.msra.mxu1 %v1804_v35  ;;  %1827 = vmatpush3.bf16.msra.mxu0 %v1824_v62 }
  0x18   :  { %1593 = vmatmul.mubr.msk.f32.gmra.mrb[8].mxu0 %vm65_vm0, %v35_v32  ;;  %1617 = vmatmul.mubr.msk.f32.gmra.mrb[8].mxu1 %vm65_vm0, %v51_v34 }
  0x19   :  { %1595 = vmatprep.mubr.msk.f32.mxu0 %vm65_vm0, %v36_v33  ;;  %1619 = vmatprep.mubr.msk.f32.mxu1 %vm65_vm0, %v52_v36 }
  0x1a   :  { %1809 = vmatprep.subr.bf16.mxu1 %v1808_v42  ;;  %1829 = vmatprep.subr.bf16.mxu0 %v1828_v0 }
  0x1b   :  { %1811 = vmatpush3.bf16.msra.mxu1 %v1808_v42  ;;  %1831 = vmatpush3.bf16.msra.mxu0 %v1828_v0 }
  0x1c   :  { %1596 = vmatmul.mubr.msk.f32.gmra.mrb[10].mxu0 %vm65_vm0, %v37_v39  ;;  %1620 = vmatmul.mubr.msk.f32.gmra.mrb[10].mxu1 %vm65_vm0, %v53_v41 }
  0x1d   :  { %1598 = vmatprep.mubr.msk.f32.mxu0 %vm65_vm0, %v38_v40  ;;  %1622 = vmatprep.mubr.msk.f32.mxu1 %vm65_vm0, %v54_v43 }
  0x1e   :  { %1813 = vmatprep.subr.bf16.mxu1 %v1812_v52  ;;  %1833 = vmatprep.subr.bf16.mxu0 %v1832_v3 }
  0x1f   :  { %1815 = vmatpush3.bf16.msra.mxu1 %v1812_v52  ;;  %1835 = vmatpush3.bf16.msra.mxu0 %v1832_v3 }
  0x20   :  { %1599 = vmatmul.mubr.msk.f32.gmra.mrb[12].mxu0 %vm65_vm0, %v39_v44  ;;  %1623 = vmatmul.mubr.msk.f32.gmra.mrb[12].mxu1 %vm65_vm0, %v55_v46 }
  0x21   :  { %1601 = vmatprep.mubr.msk.f32.mxu0 %vm65_vm0, %v40_v45  ;;  %1625 = vmatprep.mubr.msk.f32.mxu1 %vm65_vm0, %v56_v47 }
  0x22   :  { %1817 = vmatprep.subr.bf16.mxu1 %v1816_v55  ;;  %1837 = vmatprep.subr.bf16.mxu0 %v1836_v6 }
  0x23   :  { %1819 = vmatpush3.bf16.msra.mxu1 %v1816_v55  ;;  %1839 = vmatpush3.bf16.msra.mxu0 %v1836_v6 }
  0x24   :  { %1602 = vmatmul.mubr.msk.f32.gmra.mrb[14].mxu0 %vm65_vm0, %v41_v48  ;;  %1626 = vmatmul.mubr.msk.f32.gmra.mrb[14].mxu1 %vm65_vm0, %v57_v49 }
  0x25   :  { %1821 = vmatprep.subr.bf16.mxu1 %v1820_v58  ;;  %1841 = vmatprep.subr.bf16.mxu0 %v1840_v9 }
  0x27   :  { %1823 = vmatpush3.bf16.msra.mxu1 %v1820_v58  ;;  %1843 = vmatpush3.bf16.msra.mxu0 %v1840_v9 }
  0xdb   :  { %v1582_v11 = vpop.f32.mrb[0].mxu0  ;;  %v2246_v14 = vpop.f32.mrb[0].mxu1 }
  0xdc   :  { %v234_v12 = vadd.f32 %v1582_v11, %v2243_v10  ;;  %v228_v13 = vpop.f32.mrb[1].mxu0  ;;  %v2249_v16 = vpop.f32.mrb[1].mxu1  ;;  %v314_v7 = vadd.f32 %v2246_v14, %v2243_v10 }
  0xdd   :  { %v229_v15 = vadd.f32 %v2243_v10, %v228_v13  ;;  %v309_v61 = vadd.f32 %v2243_v10, %v2249_v16 }
  0xdf   :  { %1858 = vtanh.f32 %v229_v15  ;;  %v1585_v17 = vpop.f32.mrb[2].mxu0  ;;  %v2252_v20 = vpop.f32.mrb[2].mxu1 }
  0xe0   :  { %1860 = vtanh.f32 %v234_v12  ;;  %v244_v18 = vadd.f32 %v1585_v17, %v2243_v10  ;;  %v238_v19 = vpop.f32.mrb[3].mxu0  ;;  %v2255_v22 = vpop.f32.mrb[3].mxu1  ;;  %v324_v12 = vadd.f32 %v2252_v20, %v2243_v10 }
  0xe1   :  { %v239_v21 = vadd.f32 %v2243_v10, %v238_v19  ;;  %v319_v6 = vadd.f32 %v2243_v10, %v2255_v22 }
  0xe3   :  { %1862 = vtanh.f32 %v239_v21  ;;  %v1588_v23 = vpop.f32.mrb[4].mxu0  ;;  %v2258_v26 = vpop.f32.mrb[4].mxu1 }
  0xe4   :  { %1864 = vtanh.f32 %v244_v18  ;;  %v254_v24 = vadd.f32 %v1588_v23, %v2243_v10  ;;  %v248_v25 = vpop.f32.mrb[5].mxu0  ;;  %v2261_v28 = vpop.f32.mrb[5].mxu1  ;;  %v334_v17 = vadd.f32 %v2258_v26, %v2243_v10 }
  0xe5   :  { %v249_v27 = vadd.f32 %v2243_v10, %v248_v25  ;;  %v329_v11 = vadd.f32 %v2243_v10, %v2261_v28 }
  0xe7   :  { %1866 = vtanh.f32 %v249_v27  ;;  %v1591_v29 = vpop.f32.mrb[6].mxu0  ;;  %v2264_v32 = vpop.f32.mrb[6].mxu1 }
  0xe8   :  { %1868 = vtanh.f32 %v254_v24  ;;  %v264_v30 = vadd.f32 %v1591_v29, %v2243_v10  ;;  %v258_v31 = vpop.f32.mrb[7].mxu0  ;;  %v2267_v35 = vpop.f32.mrb[7].mxu1  ;;  %v344_v21 = vadd.f32 %v2264_v32, %v2243_v10 }
  0xe9   :  { %v1859_v33 = vpop.eup %1858  ;;  %v259_v34 = vadd.f32 %v2243_v10, %v258_v31  ;;  %v339_v14 = vadd.f32 %v2243_v10, %v2267_v35 }
  0xea   :  { %v1861_v36 = vpop.eup %1860  ;;  %1660 = vmatprep.mubr.f32.mxu1 %v1859_v33 }
  0xeb   :  { %1870 = vtanh.f32 %v259_v34  ;;  %v1594_v37 = vpop.f32.mrb[8].mxu0  ;;  %1661 = vmatmul.mubr.f32.vlgmr.msra.gmra.mrb[16].mxu1 %v1861_v36  ;;  %v2270_v40 = vpop.f32.mrb[8].mxu1 }
  0xec   :  { %1872 = vtanh.f32 %v264_v30  ;;  %v274_v38 = vadd.f32 %v1594_v37, %v2243_v10  ;;  %v268_v39 = vpop.f32.mrb[9].mxu0  ;;  %v2273_v43 = vpop.f32.mrb[9].mxu1  ;;  %v354_v25 = vadd.f32 %v2270_v40, %v2243_v10 }
  0xed   :  { %v1863_v41 = vpop.eup %1862  ;;  %v269_v42 = vadd.f32 %v2243_v10, %v268_v39  ;;  %v349_v20 = vadd.f32 %v2243_v10, %v2273_v43 }
  0xee   :  { %v1865_v44 = vpop.eup %1864  ;;  %1663 = vmatprep.mubr.f32.mxu1 %v1863_v41 }
  0xef   :  { %1874 = vtanh.f32 %v269_v42  ;;  %v1597_v45 = vpop.f32.mrb[10].mxu0  ;;  %1664 = vmatmul.mubr.f32.gmra.mrb[18].mxu1 %v1865_v44  ;;  %v2276_v48 = vpop.f32.mrb[10].mxu1  ;;  %v708_v44 = vld [vmem:[%s3064_s4 + $0x58] sm:$0xff] }
  0xf0   :  { %1876 = vtanh.f32 %v274_v38  ;;  %v284_v46 = vadd.f32 %v1597_v45, %v2243_v10  ;;  %v278_v47 = vpop.f32.mrb[11].mxu0  ;;  %v2279_v51 = vpop.f32.mrb[11].mxu1  ;;  %v364_v29 = vadd.f32 %v2276_v48, %v2243_v10 }
  0xf1   :  { %v1867_v49 = vpop.eup %1866  ;;  %v279_v50 = vadd.f32 %v2243_v10, %v278_v47  ;;  %v359_v24 = vadd.f32 %v2243_v10, %v2279_v51  ;;  %v710_v47 = vld [vmem:[%s3064_s4 + $0x68] sm:$0xff] }
  0xf2   :  { %v1869_v52 = vpop.eup %1868  ;;  %1666 = vmatprep.mubr.f32.mxu1 %v1867_v49  ;;  %v711_v49 = vld [vmem:[%s3064_s4 + $0x70] sm:$0xff] }
  0xf3   :  { %1878 = vtanh.f32 %v279_v50  ;;  %v1600_v53 = vpop.f32.mrb[12].mxu0  ;;  %1667 = vmatmul.mubr.f32.gmra.mrb[20].mxu1 %v1869_v52  ;;  %v2282_v56 = vpop.f32.mrb[12].mxu1  ;;  %v712_v50 = vld [vmem:[%s3064_s4 + $0x78] sm:$0xff]  ;;  %v976_v52 = vlaneseq }
  0xf4   :  { %1880 = vtanh.f32 %v284_v46  ;;  %v294_v54 = vadd.f32 %v1600_v53, %v2243_v10  ;;  %v288_v55 = vpop.f32.mrb[13].mxu0  ;;  %v368_v59 = vpop.f32.mrb[13].mxu1  ;;  %v374_v33 = vadd.f32 %v2282_v56, %v2243_v10  ;;  %v709_v46 = vld [vmem:[%s3064_s4 + $0x60] sm:$0xff]  ;;  %v1852_v51 = vpack.c.bf16 %v712_v50, %v711_v49  ;;  %v2450_v49 = vld [vmem:[%s3066_s1 + $0x50] sm:$0xff]  ;;  %v2455_v50 = vld [vmem:[%s3066_s1 + $0x68] sm:$0xff] }
  0xf5   :  { %v1871_v57 = vpop.eup %1870  ;;  %v289_v58 = vadd.f32 %v2243_v10, %v288_v55  ;;  %v369_v28 = vadd.f32 %v2243_v10, %v368_v59  ;;  %v1848_v48 = vpack.c.bf16 %v710_v47, %v709_v46  ;;  %v2337_v53 = vshrl.u32 %v976_v52, 7  ;;  %v2356_v59 = vld [vmem:[%s3066_s1 + $0x8] sm:$0xff] }
  0xf6   :  { %v1873_v60 = vpop.eup %1872  ;;  %1669 = vmatprep.mubr.f32.mxu1 %v1871_v57  ;;  %v2344_v55 = vand.u32 127, %v976_v52 }
  0xf7   :  { %1882 = vtanh.f32 %v289_v58  ;;  %v1603_v62 = vpop.f32.mrb[14].mxu0  ;;  %1670 = vmatmul.mubr.f32.gmra.mrb[22].mxu1 %v1873_v60  ;;  %v2288_v1 = vpop.f32.mrb[14].mxu1  ;;  %v982_v56 = vsub.s32 0, %v2337_v53  ;;  %v2351_v58 = vld [vmem:[%s3066_s1 + $0x10] sm:$0xff]  ;;  %v943_v60 = vld [vmem:[%s3067_s6 + $0x1] sm:$0x1] }
  0xf8   :  { %1884 = vtanh.f32 %v294_v54  ;;  %v304_v63 = vadd.f32 %v1603_v62, %v2243_v10  ;;  %v298_v0 = vpop.f32.mrb[15].mxu0  ;;  %v378_v4 = vpop.f32.mrb[15].mxu1  ;;  %v384_v36 = vadd.f32 %v2288_v1, %v2243_v10  ;;  %v2342_v54 = vld [vmem:[%s3066_s1] sm:$0xff]  ;;  %v1050_v62 = vmul.f32 -0.5, %v2356_v59 }
  0xf9   :  { %v1875_v2 = vpop.eup %1874  ;;  %v299_v3 = vadd.f32 %v2243_v10, %v298_v0  ;;  %1886 = vtanh.f32 %v309_v61  ;;  %v379_v32 = vadd.f32 %v2243_v10, %v378_v4  ;;  %v707_v10 = vld [vmem:[%s3064_s4 + $0x50] sm:$0xff]  ;;  %v1049_v57 = vmul.f32 -0.5, %v2342_v54  ;;  %v2371_v0 = vld [vmem:[%s3066_s1 + $0x28] sm:$0xff]  ;;  %v2382_v4 = vld [vmem:[%s3066_s1 + $0x20] sm:$0xff] }
  0xfa   :  { %v1877_v5 = vpop.eup %1876  ;;  %1672 = vmatprep.mubr.f32.mxu1 %v1875_v2  ;;  %v1844_v45 = vpack.c.bf16 %v708_v44, %v707_v10  ;;  %v1051_v61 = vmul.f32 -0.5, %v2351_v58  ;;  %v978_v1 = vmul.f32 1.442695, %v943_v60  ;;  %vm1048_vm2 = vcmp.lt.s32.totalorder %v2344_v55, 4  ;;  %v2439_v44 = vld [vmem:[%s3066_s1 + $0x58] sm:$0xff] }
  0xfb   :  { %1888 = vtanh.f32 %v299_v3  ;;  %1673 = vmatmul.mubr.f32.gmra.mrb[24].mxu1 %v1877_v5  ;;  %v1081_v2 = vmul.f32 %v1049_v57, %v2342_v54  ;;  %v2377_v3 = vrot.slane %v943_v60, %v982_v56  ;;  %v2387_v5 = vld [vmem:[%s3066_s1 + $0x38] sm:$0xff]  ;;  %vm1310_vm3 = vcmp.eq.s32.totalorder %v2344_v55, 5 }
  0xfc   :  { %1890 = vtanh.f32 %v304_v63  ;;  %1845 = vmatprep.subr.bf16.mxu0 %v1844_v45  ;;  %v2366_v63 = vld [vmem:[%s3066_s1 + $0x18] sm:$0xff] }
  0xfd   :  { %v1879_v8 = vpop.eup %1878  ;;  %1892 = vtanh.f32 %v319_v6  ;;  %1847 = vmatpush3.bf16.msra.mxu0 %v1844_v45  ;;  %v1083_v6 = vmul.f32 %v1051_v61, %v2351_v58 }
  0xfe   :  { %v1881_v9 = vpop.eup %1880  ;;  %1675 = vmatprep.mubr.f32.mxu1 %v1879_v8  ;;  %1894 = vtanh.f32 %v314_v7  ;;  %1849 = vmatprep.subr.bf16.mxu0 %v1848_v48  ;;  %v1082_v7 = vmul.f32 %v1050_v62, %v2356_v59  ;;  %v1052_v8 = vmul.f32 -0.5, %v2366_v63 }
  0xff   :  { %1676 = vmatmul.mubr.f32.gmra.mrb[26].mxu1 %v1881_v9  ;;  %1896 = vtanh.f32 %v329_v11  ;;  %v1054_v9 = vmul.f32 -0.5, %v2371_v0  ;;  %v2396_v11 = vld [vmem:[%s3066_s1 + $0x30] sm:$0xff] }
 0x100   :  { %1898 = vtanh.f32 %v324_v12  ;;  %v1117_v12 = vsub.f32 %v1081_v2, %v2377_v3  ;;  %v1060_v2 = vmul.f32 -0.5, %v2439_v44 }
 0x101   :  { %v1883_v13 = vpop.eup %1882  ;;  %1900 = vtanh.f32 %v339_v14  ;;  %1851 = vmatpush3.bf16.msra.mxu0 %v1848_v48  ;;  %v1119_v14 = vsub.f32 %v1083_v6, %v2377_v3  ;;  %v2467_v6 = vld [vmem:[%s3066_s1 + $0x60] sm:$0xff] }
 0x102   :  { %v1885_v15 = vpop.eup %1884  ;;  %1678 = vmatprep.mubr.f32.mxu1 %v1883_v13  ;;  %1902 = vtanh.f32 %v334_v17  ;;  %1853 = vmatprep.subr.bf16.mxu0 %v1852_v51  ;;  %v1053_v13 = vmul.f32 -0.5, %v2382_v4  ;;  %v1084_v17 = vmul.f32 %v1052_v8, %v2366_v63 }
 0x103   :  { %1679 = vmatmul.mubr.f32.gmra.mrb[28].mxu1 %v1885_v15  ;;  %v1887_v16 = vpop.eup %1886  ;;  %1904 = vtanh.f32 %v349_v20  ;;  %v1056_v15 = vmul.f32 -0.5, %v2387_v5 }
 0x104   :  { %1906 = vtanh.f32 %v344_v21  ;;  %v1085_v20 = vmul.f32 %v1053_v13, %v2382_v4  ;;  %v1062_v13 = vmul.f32 -0.5, %v2455_v50 }
 0x105   :  { %v1889_v18 = vpop.eup %1888  ;;  %1908 = vtanh.f32 %v359_v24  ;;  %1855 = vmatpush3.bf16.msra.mxu0 %v1852_v51  ;;  %v1088_v21 = vmul.f32 %v1056_v15, %v2387_v5  ;;  %v2484_v15 = vld [vmem:[%s3066_s1 + $0x70] sm:$0xff] }
 0x106   :  { %v1891_v19 = vpop.eup %1890  ;;  %1681 = vmatprep.mubr.f32.mxu1 %v1889_v18  ;;  %1910 = vtanh.f32 %v354_v25  ;;  %v1086_v18 = vmul.f32 %v1054_v9, %v2371_v0  ;;  %v1120_v25 = vsub.f32 %v1084_v17, %v2377_v3 }
 0x107   :  { %1682 = vmatmul.mubr.f32.gmra.mrb[30].mxu1 %v1891_v19  ;;  %v1893_v22 = vpop.eup %1892  ;;  %1912 = vtanh.f32 %v369_v28  ;;  %v1414_v19 = vadd.f32 -0.9189385, %v1117_v12  ;;  %v1121_v28 = vsub.f32 %v1085_v20, %v2377_v3  ;;  %v1059_v12 = vmul.f32 -0.5, %v2450_v49 }
 0x108   :  { %1684 = vmatprep.mubr.f32.mxu1 %v1887_v16  ;;  %v1895_v23 = vpop.eup %1894  ;;  %1914 = vtanh.f32 %v364_v29  ;;  %v1118_v16 = vsub.f32 %v1082_v7, %v2377_v3  ;;  %v1124_v29 = vsub.f32 %v1088_v21, %v2377_v3  ;;  %v2472_v7 = vld [vmem:[%s3066_s1 + $0x78] sm:$0xff] }
 0x109   :  { %v1897_v26 = vpop.eup %1896  ;;  %1916 = vtanh.f32 %v379_v32  ;;  %v1091_v17 = vmul.f32 %v1059_v12, %v2450_v49  ;;  %v1064_v20 = vmul.f32 -0.5, %v2472_v7 }
 0x10a   :  { %v1899_v27 = vpop.eup %1898  ;;  %1918 = vtanh.f32 %v374_v33  ;;  %v1415_v24 = vadd.f32 -0.9189385, %v1118_v16 }
 0x10b   :  { %1685 = vmatmul.mubr.f32.gmra.mrb[32].mxu1 %v1895_v23  ;;  %v1901_v30 = vpop.eup %1900  ;;  %1920 = vtanh.f32 %v384_v36  ;;  %v1416_v23 = vadd.f32 -0.9189385, %v1119_v14  ;;  %v2428_v36 = vld [vmem:[%s3066_s1 + $0x40] sm:$0xff] }
 0x10c   :  { %1687 = vmatprep.mubr.f32.mxu1 %v1893_v22  ;;  %v1903_v31 = vpop.eup %1902  ;;  %1922 = vpow2.f32 %v978_v1  ;;  %v1055_v22 = vmul.f32 -0.5, %v2396_v11  ;;  %v1057_v48 = vmul.f32 -0.5, %v2428_v36 }
 0x10d   :  { %v1905_v34 = vpop.eup %1904  ;;  %v1183_v33 = vsel %vm1048_vm2, %v1416_v23, 0.0 }
 0x10e   :  { %v1907_v35 = vpop.eup %1906  ;;  %v1089_v1 = vmul.f32 %v1057_v48, %v2428_v36 }
 0x10f   :  { %1688 = vmatmul.mubr.f32.gmra.mrb[34].mxu1 %v1899_v27  ;;  %v1909_v37 = vpop.eup %1908  ;;  %v1181_v27 = vsel %vm1048_vm2, %v1414_v19, 0.0  ;;  %v1061_v19 = vmul.f32 -0.5, %v2467_v6 }
 0x110   :  { %1690 = vmatprep.mubr.f32.mxu1 %v1897_v26  ;;  %v1911_v38 = vpop.eup %1910  ;;  %v1122_v26 = vsub.f32 %v1086_v18, %v2377_v3  ;;  %v1214_v32 = vsel %vm1213_vm1, %v1181_v27, 0.0  ;;  %v1125_v53 = vsub.f32 %v1089_v1, %v2377_v3  ;;  %v1094_v18 = vmul.f32 %v1062_v13, %v2455_v50 }
 0x111   :  { %v1913_v39 = vpop.eup %1912  ;;  %1215 = vadd.xlane.f32.xlu0 %v1214_v32 }
 0x112   :  { %v1915_v40 = vpop.eup %1914  ;;  %v1130_v27 = vsub.f32 %v1094_v18, %v2377_v3 }
 0x113   :  { %1691 = vmatmul.mubr.f32.gmra.mrb[36].mxu1 %v1903_v31  ;;  %v1917_v41 = vpop.eup %1916  ;;  %v2418_v31 = vld [vmem:[%s3066_s1 + $0x48] sm:$0xff] }
 0x114   :  { %1693 = vmatprep.mubr.f32.mxu1 %v1901_v30  ;;  %v1919_v42 = vpop.eup %1918  ;;  %v1087_v30 = vmul.f32 %v1055_v22, %v2396_v11  ;;  %v1058_v10 = vmul.f32 -0.5, %v2418_v31  ;;  %v1422_v22 = vadd.f32 -0.9189385, %v1125_v53  ;;  %v2559_v53 = vld [vmem:[%s3066_s1 + $0xb8] sm:$0xff] }
 0x115   :  { %v1921_v43 = vpop.eup %1920 }
 0x116   :  { %v1923_v60 = vpop.eup %1922  ;;  %v1090_v62 = vmul.f32 %v1058_v10, %v2418_v31 }
 0x117   :  { %1694 = vmatmul.mubr.f32.gmra.mrb[38].mxu1 %v1907_v35  ;;  %v1417_v35 = vadd.f32 -0.9189385, %v1120_v25  ;;  %v2476_v8 = vrot.slane %v1923_v60, %v982_v56  ;;  %v1092_v56 = vmul.f32 %v1060_v2, %v2439_v44 }
 0x118   :  { %1696 = vmatprep.mubr.f32.mxu1 %v1905_v34  ;;  %v1182_v34 = vsel %vm1048_vm2, %v1415_v24, 0.0  ;;  %v1126_v16 = vsub.f32 %v1090_v62, %v2377_v3  ;;  %v1063_v24 = vmul.f32 -0.5, %v2484_v15 }
 0x119   :  { %v1128_v23 = vsub.f32 %v1092_v56, %v2377_v3 }
 0x11a   :  { %v1423_v21 = vadd.f32 -0.9189385, %v1126_v16 }
 0x11b   :  { %1697 = vmatmul.mubr.f32.gmra.mrb[40].mxu1 %v1911_v38  ;;  %v1217_v38 = vsel %vm1213_vm1, %v1182_v34, 0.0  ;;  %v1425_v32 = vadd.f32 -0.9189385, %v1128_v23  ;;  %v2509_v34 = vld [vmem:[%s3066_s1 + $0x88] sm:$0xff] }
 0x11c   :  { %1699 = vmatprep.mubr.f32.mxu1 %v1909_v37  ;;  %v1220_v37 = vsel %vm1213_vm1, %v1183_v33, 0.0  ;;  %1218 = vadd.xlane.f32.xlu0 %v1217_v38  ;;  %v1095_v33 = vmul.f32 %v1063_v24, %v2484_v15  ;;  %v1066_v10 = vmul.f32 -0.5, %v2509_v34 }
 0x11d   :  { %1221 = vadd.xlane.f32.xlu1 %v1220_v37  ;;  %v1096_v37 = vmul.f32 %v1064_v20, %v2472_v7  ;;  %v2568_v20 = vld [vmem:[%s3066_s1 + $0xb0] sm:$0xff] }
 0x11e   :  { %v1098_v60 = vmul.f32 %v1066_v10, %v2509_v34 }
 0x11f   :  { %1700 = vmatmul.mubr.f32.gmra.mrb[42].mxu1 %v1915_v40  ;;  %v1418_v40 = vadd.f32 -0.9189385, %v1121_v28  ;;  %v1093_v28 = vmul.f32 %v1061_v19, %v2467_v6 }
 0x120   :  { %1702 = vmatprep.mubr.f32.mxu1 %v1913_v39  ;;  %v1419_v39 = vadd.f32 -0.9189385, %v1122_v26  ;;  %v1127_v26 = vsub.f32 %v1091_v17, %v2377_v3  ;;  %v1134_v16 = vsub.f32 %v1098_v60, %v2377_v3 }
 0x121   :  { %v1185_v47 = vsel %vm1048_vm2, %v1418_v40, 0.0  ;;  %v1129_v38 = vsub.f32 %v1093_v28, %v2377_v3  ;;  %v2521_v40 = vld [vmem:[%s3066_s1 + $0x98] sm:$0xff] }
 0x122   :  { %v1186_v46 = vsel %vm1048_vm2, %v1419_v39, 0.0  ;;  %v1226_v61 = vsel %vm1213_vm1, %v1185_v47, 0.0  ;;  %v2516_v39 = vld [vmem:[%s3066_s1 + $0x80] sm:$0xff]  ;;  %v1192_v47 = vsel %vm1048_vm2, %v1425_v32, 0.0  ;;  %v1068_v62 = vmul.f32 -0.5, %v2521_v40 }
 0x123   :  { %1703 = vmatmul.mubr.f32.gmra.mrb[44].mxu1 %v1919_v42  ;;  %v1421_v42 = vadd.f32 -0.9189385, %v1124_v29  ;;  %v1229_v51 = vsel %vm1213_vm1, %v1186_v46, 0.0  ;;  %1227 = vadd.xlane.f32.xlu0 %v1226_v61  ;;  %v1190_v29 = vsel %vm1048_vm2, %v1423_v21, 0.0  ;;  %v2535_v46 = vld [vmem:[%s3066_s1 + $0xa8] sm:$0xff]  ;;  %v1065_v61 = vmul.f32 -0.5, %v2516_v39 }
 0x124   :  { %1705 = vmatprep.mubr.f32.mxu1 %v1917_v41  ;;  %v1184_v41 = vsel %vm1048_vm2, %v1417_v35, 0.0  ;;  %v1424_v35 = vadd.f32 -0.9189385, %v1127_v26  ;;  %v1070_v2 = vmul.f32 -0.5, %v2535_v46  ;;  %v1247_v56 = vsel %vm1213_vm1, %v1192_v47, 0.0 }
 0x125   :  { %v1223_v45 = vsel %vm1213_vm1, %v1184_v41, 0.0  ;;  %v1188_v52 = vsel %vm1048_vm2, %v1421_v42, 0.0  ;;  %v1241_v41 = vsel %vm1213_vm1, %v1190_v29, 0.0  ;;  %v1097_v17 = vmul.f32 %v1065_v61, %v2516_v39 }
 0x126   :  { %1224 = vadd.xlane.f32.xlu1 %v1223_v45  ;;  %v1235_v9 = vsel %vm1213_vm1, %v1188_v52, 0.0  ;;  %v2530_v45 = vld [vmem:[%s3066_s1 + $0x90] sm:$0xff]  ;;  %v1191_v48 = vsel %vm1048_vm2, %v1424_v35, 0.0  ;;  %v1426_v52 = vadd.f32 -0.9189385, %v1129_v38  ;;  %v1100_v18 = vmul.f32 %v1068_v62, %v2521_v40 }
 0x127   :  { %1706 = vmatmul.mubr.f32.gmra.mrb[46].mxu1 %v1921_v43  ;;  %v1123_v43 = vsub.f32 %v1087_v30, %v2377_v3  ;;  %v1189_v30 = vsel %vm1048_vm2, %v1422_v22, 0.0  ;;  %v1067_v1 = vmul.f32 -0.5, %v2530_v45  ;;  %v1244_v12 = vsel %vm1213_vm1, %v1191_v48, 0.0  ;;  %v2597_v48 = vld [vmem:[%s3066_s1 + $0xc0] sm:$0xff] }
 0x128   :  { %v1238_v42 = vsel %vm1213_vm1, %v1189_v30, 0.0  ;;  %v1193_v13 = vsel %vm1048_vm2, %v1426_v52, 0.0  ;;  %v1102_v26 = vmul.f32 %v1070_v2, %v2535_v46  ;;  %v1431_v29 = vadd.f32 -0.9189385, %v1134_v16 }
 0x129   :  { %v1420_v57 = vadd.f32 -0.9189385, %v1123_v43  ;;  %v1131_v43 = vsub.f32 %v1095_v33, %v2377_v3  ;;  %v1099_v19 = vmul.f32 %v1067_v1, %v2530_v45  ;;  %v1250_v24 = vsel %vm1213_vm1, %v1193_v13, 0.0  ;;  %v2611_v13 = vld [vmem:[%s3066_s1 + $0xd0] sm:$0xff] }
 0x12a   :  { %1230 = vadd.xlane.f32.xlu1 %v1229_v51  ;;  %v1427_v51 = vadd.f32 -0.9189385, %v1130_v27  ;;  %v1072_v27 = vmul.f32 -0.5, %v2559_v53  ;;  %v1136_v30 = vsub.f32 %v1100_v18, %v2377_v3  ;;  %v1071_v32 = vmul.f32 -0.5, %v2568_v20 }
 0x12b   :  { %v1187_v14 = vsel %vm1048_vm2, %v1420_v57, 0.0  ;;  %v1132_v57 = vsub.f32 %v1096_v37, %v2377_v3  ;;  %v1135_v37 = vsub.f32 %v1099_v19, %v2377_v3  ;;  %v1138_v10 = vsub.f32 %v1102_v26, %v2377_v3 }
 0x12c   :  { %v1232_v25 = vsel %vm1213_vm1, %v1187_v14, 0.0  ;;  %v1428_v14 = vadd.f32 -0.9189385, %v1131_v43  ;;  %v1194_v21 = vsel %vm1048_vm2, %v1427_v51, 0.0  ;;  %v1104_v47 = vmul.f32 %v1072_v27, %v2559_v53  ;;  %v2632_v27 = vld [vmem:[%s3066_s1 + $0xe8] sm:$0xff] }
 0x12d   :  { %1233 = vadd.xlane.f32.xlu0 %v1232_v25  ;;  %v1429_v22 = vadd.f32 -0.9189385, %v1132_v57  ;;  %v1133_v25 = vsub.f32 %v1097_v17, %v2377_v3  ;;  %v1253_v33 = vsel %vm1213_vm1, %v1194_v21, 0.0  ;;  %v1198_v51 = vsel %vm1048_vm2, %v1431_v29, 0.0  ;;  %v2618_v17 = vld [vmem:[%s3066_s1 + $0xd8] sm:$0xff]  ;;  %v2638_v29 = vld [vmem:[%s3066_s1 + $0xe0] sm:$0xff] }
 0x12e   :  { %1236 = vadd.xlane.f32.xlu1 %v1235_v9  ;;  %v2550_v9 = vld [vmem:[%s3066_s1 + $0xa0] sm:$0xff]  ;;  %v1195_v28 = vsel %vm1048_vm2, %v1428_v14, 0.0  ;;  %v1433_v52 = vadd.f32 -0.9189385, %v1136_v30  ;;  %v1103_v57 = vmul.f32 %v1071_v32, %v2568_v20  ;;  %v1432_v1 = vadd.f32 -0.9189385, %v1135_v37 }
 0x12f   :  { %v1069_v23 = vmul.f32 -0.5, %v2550_v9  ;;  %v1430_v35 = vadd.f32 -0.9189385, %v1133_v25  ;;  %v1256_v43 = vsel %vm1213_vm1, %v1195_v28, 0.0  ;;  %v1265_v14 = vsel %vm1213_vm1, %v1198_v51, 0.0 }
 0x130   :  { %v1435_v16 = vadd.f32 -0.9189385, %v1138_v10  ;;  %v1200_v19 = vsel %vm1048_vm2, %v1433_v52, 0.0  ;;  %v1139_v21 = vsub.f32 %v1103_v57, %v2377_v3  ;;  %v1075_v26 = vmul.f32 -0.5, %v2611_v13  ;;  %v2655_v57 = vld [vmem:[%s3066_s1 + $0xf0] sm:$0xff] }
 0x131   :  { %1239 = vadd.xlane.f32.xlu0 %v1238_v42  ;;  %v1101_v38 = vmul.f32 %v1069_v23, %v2550_v9  ;;  %v1196_v42 = vsel %vm1048_vm2, %v1429_v22, 0.0  ;;  %v1197_v62 = vsel %vm1048_vm2, %v1430_v35, 0.0  ;;  %v1199_v23 = vsel %vm1048_vm2, %v1432_v1, 0.0 }
 0x132   :  { %1242 = vadd.xlane.f32.xlu1 %v1241_v41  ;;  %v2587_v41 = vld [vmem:[%s3066_s1 + $0xc8] sm:$0xff]  ;;  %v1259_v61 = vsel %vm1213_vm1, %v1196_v42, 0.0  ;;  %v1262_v18 = vsel %vm1213_vm1, %v1197_v62, 0.0  ;;  %v1076_v28 = vmul.f32 -0.5, %v2618_v17  ;;  %v1271_v30 = vsel %vm1213_vm1, %v1200_v19, 0.0  ;;  %v2663_v62 = vld [vmem:[%s3066_s1 + $0xf8] sm:$0xff] }
 0x133   :  { %v1074_v60 = vmul.f32 -0.5, %v2587_v41  ;;  %v1137_v2 = vsub.f32 %v1101_v38, %v2377_v3  ;;  %v1202_v32 = vsel %vm1048_vm2, %v1435_v16, 0.0  ;;  %v1268_v35 = vsel %vm1213_vm1, %v1199_v23, 0.0  ;;  %v2677_v23 = vld [vmem:[%s3065_s5 + $0x1] ss:$0 sm:$0xff] }
 0x134   :  { %v1436_v37 = vadd.f32 -0.9189385, %v1139_v21  ;;  %v1078_v42 = vmul.f32 -0.5, %v2632_v27  ;;  %v1077_v51 = vmul.f32 -0.5, %v2638_v29  ;;  %v1108_v52 = vmul.f32 %v1076_v28, %v2618_v17 }
 0x135   :  { %1245 = vadd.xlane.f32.xlu0 %v1244_v12  ;;  %v1073_v12 = vmul.f32 -0.5, %v2597_v48  ;;  %v1106_v22 = vmul.f32 %v1074_v60, %v2587_v41  ;;  %v1277_v60 = vsel %vm1213_vm1, %v1202_v32, 0.0  ;;  %v1079_v19 = vmul.f32 -0.5, %v2655_v57 }
 0x136   :  { %1248 = vadd.xlane.f32.xlu1 %v1247_v56  ;;  %v1140_v56 = vsub.f32 %v1104_v47, %v2377_v3  ;;  %v1107_v47 = vmul.f32 %v1075_v26, %v2611_v13  ;;  %v1144_v21 = vsub.f32 %v1108_v52, %v2377_v3 }
 0x137   :  { %v1105_v25 = vmul.f32 %v1073_v12, %v2597_v48  ;;  %v1142_v38 = vsub.f32 %v1106_v22, %v2377_v3  ;;  %v1080_v22 = vmul.f32 -0.5, %v2663_v62 }
 0x139   :  { %1251 = vadd.xlane.f32.xlu0 %v1250_v24  ;;  %v1434_v24 = vadd.f32 -0.9189385, %v1137_v2  ;;  %v1141_v10 = vsub.f32 %v1105_v25, %v2377_v3  ;;  %v1203_v2 = vsel %vm1048_vm2, %v1436_v37, 0.0  ;;  %v1439_v12 = vadd.f32 -0.9189385, %v1142_v38 }
 0x13a   :  { %1254 = vadd.xlane.f32.xlu1 %v1253_v33  ;;  %v1437_v33 = vadd.f32 -0.9189385, %v1140_v56  ;;  %v1143_v56 = vsub.f32 %v1107_v47, %v2377_v3  ;;  %v1280_v25 = vsel %vm1213_vm1, %v1203_v2, 0.0  ;;  %v1111_v37 = vmul.f32 %v1079_v19, %v2655_v57 }
 0x13b   :  { %v1438_v16 = vadd.f32 -0.9189385, %v1141_v10  ;;  %v1206_v26 = vsel %vm1048_vm2, %v1439_v12, 0.0  ;;  %v1112_v10 = vmul.f32 %v1080_v22, %v2663_v62 }
 0x13c   :  { %v1147_v12 = vsub.f32 %v1111_v37, %v2377_v3 }
 0x13d   :  { %1257 = vadd.xlane.f32.xlu0 %v1256_v43  ;;  %v1201_v43 = vsel %vm1048_vm2, %v1434_v24, 0.0  ;;  %v1205_v32 = vsel %vm1048_vm2, %v1438_v16, 0.0 }
 0x13e   :  { %1260 = vadd.xlane.f32.xlu1 %v1259_v61  ;;  %v1204_v61 = vsel %vm1048_vm2, %v1437_v33, 0.0  ;;  %v1274_v1 = vsel %vm1213_vm1, %v1201_v43, 0.0  ;;  %v1440_v33 = vadd.f32 -0.9189385, %v1143_v56  ;;  %v1441_v43 = vadd.f32 -0.9189385, %v1144_v21 }
 0x13f   :  { %v1283_v24 = vsel %vm1213_vm1, %v1204_v61, 0.0  ;;  %v1286_v52 = vsel %vm1213_vm1, %v1205_v32, 0.0 }
 0x140   :  { %v1208_v56 = vsel %vm1048_vm2, %v1441_v43, 0.0 }
 0x141   :  { %1263 = vadd.xlane.f32.xlu0 %v1262_v18  ;;  %v1109_v18 = vmul.f32 %v1077_v51, %v2638_v29  ;;  %v1289_v51 = vsel %vm1213_vm1, %v1206_v26, 0.0  ;;  %v1444_v26 = vadd.f32 -0.9189385, %v1147_v12 }
 0x142   :  { %1266 = vadd.xlane.f32.xlu1 %v1265_v14  ;;  %v1110_v14 = vmul.f32 %v1078_v42, %v2632_v27 }
 0x144   :  { %v1146_v28 = vsub.f32 %v1110_v14, %v2377_v3 }
 0x145   :  { %1269 = vadd.xlane.f32.xlu0 %v1268_v35  ;;  %v1145_v35 = vsub.f32 %v1109_v18, %v2377_v3  ;;  %v1148_v18 = vsub.f32 %v1112_v10, %v2377_v3 }
 0x146   :  { %1272 = vadd.xlane.f32.xlu1 %v1271_v30 }
 0x147   :  { %v1442_v2 = vadd.f32 -0.9189385, %v1145_v35  ;;  %v1445_v32 = vadd.f32 -0.9189385, %v1148_v18 }
 0x149   :  { %1275 = vadd.xlane.f32.xlu0 %v1274_v1  ;;  %v1207_v1 = vsel %vm1048_vm2, %v1440_v33, 0.0 }
 0x14a   :  { %1278 = vadd.xlane.f32.xlu1 %v1277_v60  ;;  %v1443_v60 = vadd.f32 -0.9189385, %v1146_v28  ;;  %v1292_v21 = vsel %vm1213_vm1, %v1207_v1, 0.0 }
 0x14c   :  { %v1210_v3 = vsel %vm1048_vm2, %v1443_v60, 0.0 }
 0x14d   :  { %1281 = vadd.xlane.f32.xlu0 %v1280_v25  ;;  %v1209_v25 = vsel %vm1048_vm2, %v1442_v2, 0.0 }
 0x14e   :  { %1284 = vadd.xlane.f32.xlu1 %v1283_v24  ;;  %v1295_v24 = vsel %vm1213_vm1, %v1208_v56, 0.0  ;;  %v1298_v35 = vsel %vm1213_vm1, %v1209_v25, 0.0 }
 0x151   :  { %1287 = vadd.xlane.f32.xlu0 %v1286_v52 }
 0x152   :  { %1290 = vadd.xlane.f32.xlu1 %v1289_v51 }
 0x155   :  { %1293 = vadd.xlane.f32.xlu0 %v1292_v21 }
 0x156   :  { %1296 = vadd.xlane.f32.xlu1 %v1295_v24 }
 0x159   :  { %1299 = vadd.xlane.f32.xlu0 %v1298_v35 }
 0x1be   :  { %v1662_v30 = vpop.f32.mrb[16].mxu1 }
 0x1bf   :  { %v512_v38 = vadd.f32 %v1662_v30, %v2677_v23  ;;  %v506_v42 = vpop.f32.mrb[17].mxu1 }
 0x1c0   :  { %v507_v47 = vadd.f32 %v2677_v23, %v506_v42  ;;  %v1211_v42 = vsel %vm1048_vm2, %v1444_v26, 0.0 }
 0x1c2   :  { %1924 = vtanh.f32 %v507_v47  ;;  %v1665_v61 = vpop.f32.mrb[18].mxu1  ;;  %v1212_v47 = vsel %vm1048_vm2, %v1445_v32, 0.0 }
 0x1c3   :  { %1926 = vtanh.f32 %v512_v38  ;;  %v522_v14 = vadd.f32 %v1665_v61, %v2677_v23  ;;  %v516_v16 = vpop.f32.mrb[19].mxu1  ;;  %v1301_v38 = vsel %vm1213_vm1, %v1210_v3, 0.0  ;;  %v1304_v61 = vsel %vm1213_vm1, %v1211_v42, 0.0 }
 0x1c4   :  { %v517_v19 = vadd.f32 %v2677_v23, %v516_v16  ;;  %1302 = vadd.xlane.f32.xlu1 %v1301_v38  ;;  %v1307_v2 = vsel %vm1213_vm1, %v1212_v47, 0.0  ;;  %1305 = vadd.xlane.f32.xlu0 %v1304_v61 }
 0x1c6   :  { %1928 = vtanh.f32 %v517_v19  ;;  %v1668_v22 = vpop.f32.mrb[20].mxu1 }
 0x1c7   :  { %1930 = vtanh.f32 %v522_v14  ;;  %v532_v28 = vadd.f32 %v1668_v22, %v2677_v23  ;;  %v526_v30 = vpop.f32.mrb[21].mxu1 }
 0x1c8   :  { %v527_v33 = vadd.f32 %v2677_v23, %v526_v30  ;;  %1308 = vadd.xlane.f32.xlu1 %v1307_v2 }
 0x1ca   :  { %1932 = vtanh.f32 %v527_v33  ;;  %v1671_v37 = vpop.f32.mrb[22].mxu1 }
 0x1cb   :  { %1934 = vtanh.f32 %v532_v28  ;;  %v542_v43 = vadd.f32 %v1671_v37, %v2677_v23  ;;  %v536_v10 = vpop.f32.mrb[23].mxu1 }
 0x1cc   :  { %v1925_v51 = vpop.eup %1924  ;;  %v537_v52 = vadd.f32 %v2677_v23, %v536_v10 }
 0x1cd   :  { %v1927_v60 = vpop.eup %1926  ;;  %1740 = vmatprep.mubr.f32.mxu0 %v1925_v51 }
 0x1ce   :  { %1936 = vtanh.f32 %v537_v52  ;;  %v1674_v1 = vpop.f32.mrb[24].mxu1  ;;  %1741 = vmatmul.mubr.f32.vlgmr.msra.gmra.mrb[16].mxu0 %v1927_v60 }
 0x1cf   :  { %1938 = vtanh.f32 %v542_v43  ;;  %v552_v12 = vadd.f32 %v1674_v1, %v2677_v23  ;;  %v546_v14 = vpop.f32.mrb[25].mxu1 }
 0x1d0   :  { %v1929_v16 = vpop.eup %1928  ;;  %v547_v56 = vadd.f32 %v2677_v23, %v546_v14 }
 0x1d1   :  { %v1931_v18 = vpop.eup %1930  ;;  %1743 = vmatprep.mubr.f32.mxu0 %v1929_v16 }
 0x1d2   :  { %1940 = vtanh.f32 %v547_v56  ;;  %v1677_v19 = vpop.f32.mrb[26].mxu1  ;;  %1744 = vmatmul.mubr.f32.gmra.mrb[18].mxu0 %v1931_v18 }
 0x1d3   :  { %1942 = vtanh.f32 %v552_v12  ;;  %v562_v21 = vadd.f32 %v1677_v19, %v2677_v23  ;;  %v556_v22 = vpop.f32.mrb[27].mxu1 }
 0x1d4   :  { %v1933_v24 = vpop.eup %1932  ;;  %v557_v25 = vadd.f32 %v2677_v23, %v556_v22 }
 0x1d5   :  { %v1935_v26 = vpop.eup %1934  ;;  %1746 = vmatprep.mubr.f32.mxu0 %v1933_v24 }
 0x1d6   :  { %1944 = vtanh.f32 %v557_v25  ;;  %v1680_v28 = vpop.f32.mrb[28].mxu1  ;;  %1747 = vmatmul.mubr.f32.gmra.mrb[20].mxu0 %v1935_v26 }
 0x1d7   :  { %1946 = vtanh.f32 %v562_v21  ;;  %v572_v30 = vadd.f32 %v1680_v28, %v2677_v23  ;;  %v566_v3 = vpop.f32.mrb[29].mxu1 }
 0x1d8   :  { %v1937_v32 = vpop.eup %1936  ;;  %v567_v33 = vadd.f32 %v2677_v23, %v566_v3 }
 0x1d9   :  { %v1939_v35 = vpop.eup %1938  ;;  %1749 = vmatprep.mubr.f32.mxu0 %v1937_v32 }
 0x1da   :  { %1948 = vtanh.f32 %v567_v33  ;;  %v1683_v37 = vpop.f32.mrb[30].mxu1  ;;  %1750 = vmatmul.mubr.f32.gmra.mrb[22].mxu0 %v1939_v35 }
 0x1db   :  { %1950 = vtanh.f32 %v572_v30  ;;  %v582_v38 = vadd.f32 %v1683_v37, %v2677_v23  ;;  %v576_v42 = vpop.f32.mrb[31].mxu1 }
 0x1dc   :  { %v1941_v43 = vpop.eup %1940  ;;  %v577_v10 = vadd.f32 %v2677_v23, %v576_v42 }
 0x1dd   :  { %v1943_v47 = vpop.eup %1942  ;;  %1752 = vmatprep.mubr.f32.mxu0 %v1941_v43 }
 0x1de   :  { %1952 = vtanh.f32 %v577_v10  ;;  %v1686_v51 = vpop.f32.mrb[32].mxu1  ;;  %1753 = vmatmul.mubr.f32.gmra.mrb[24].mxu0 %v1943_v47 }
 0x1df   :  { %1954 = vtanh.f32 %v582_v38  ;;  %v592_v52 = vadd.f32 %v1686_v51, %v2677_v23  ;;  %v586_v60 = vpop.f32.mrb[33].mxu1 }
 0x1e0   :  { %v1945_v61 = vpop.eup %1944  ;;  %v587_v1 = vadd.f32 %v2677_v23, %v586_v60 }
 0x1e1   :  { %v1947_v2 = vpop.eup %1946  ;;  %1755 = vmatprep.mubr.f32.mxu0 %v1945_v61 }
 0x1e2   :  { %1956 = vtanh.f32 %v587_v1  ;;  %v1689_v12 = vpop.f32.mrb[34].mxu1  ;;  %1756 = vmatmul.mubr.f32.gmra.mrb[26].mxu0 %v1947_v2 }
 0x1e3   :  { %1958 = vtanh.f32 %v592_v52  ;;  %v602_v14 = vadd.f32 %v1689_v12, %v2677_v23  ;;  %v596_v16 = vpop.f32.mrb[35].mxu1 }
 0x1e4   :  { %v1949_v56 = vpop.eup %1948  ;;  %v597_v18 = vadd.f32 %v2677_v23, %v596_v16 }
 0x1e5   :  { %v1951_v19 = vpop.eup %1950  ;;  %1758 = vmatprep.mubr.f32.mxu0 %v1949_v56 }
 0x1e6   :  { %1960 = vtanh.f32 %v597_v18  ;;  %v1692_v21 = vpop.f32.mrb[36].mxu1  ;;  %1759 = vmatmul.mubr.f32.gmra.mrb[28].mxu0 %v1951_v19 }
 0x1e7   :  { %1962 = vtanh.f32 %v602_v14  ;;  %v612_v22 = vadd.f32 %v1692_v21, %v2677_v23  ;;  %v606_v24 = vpop.f32.mrb[37].mxu1 }
 0x1e8   :  { %v1953_v25 = vpop.eup %1952  ;;  %v607_v26 = vadd.f32 %v2677_v23, %v606_v24 }
 0x1e9   :  { %v1955_v28 = vpop.eup %1954  ;;  %1761 = vmatprep.mubr.f32.mxu0 %v1953_v25 }
 0x1ea   :  { %1964 = vtanh.f32 %v607_v26  ;;  %v1695_v30 = vpop.f32.mrb[38].mxu1  ;;  %1762 = vmatmul.mubr.f32.gmra.mrb[30].mxu0 %v1955_v28 }
 0x1eb   :  { %1966 = vtanh.f32 %v612_v22  ;;  %v622_v3 = vadd.f32 %v1695_v30, %v2677_v23  ;;  %v616_v32 = vpop.f32.mrb[39].mxu1 }
 0x1ec   :  { %v1957_v33 = vpop.eup %1956  ;;  %v617_v35 = vadd.f32 %v2677_v23, %v616_v32 }
 0x1ed   :  { %v1959_v37 = vpop.eup %1958  ;;  %1764 = vmatprep.mubr.f32.mxu0 %v1957_v33 }
 0x1ee   :  { %1968 = vtanh.f32 %v617_v35  ;;  %v1698_v38 = vpop.f32.mrb[40].mxu1  ;;  %1765 = vmatmul.mubr.f32.gmra.mrb[32].mxu0 %v1959_v37 }
 0x1ef   :  { %1970 = vtanh.f32 %v622_v3  ;;  %v632_v42 = vadd.f32 %v1698_v38, %v2677_v23  ;;  %v626_v43 = vpop.f32.mrb[41].mxu1 }
 0x1f0   :  { %v1961_v10 = vpop.eup %1960  ;;  %v627_v47 = vadd.f32 %v2677_v23, %v626_v43  ;;  %v1216_v43 = vpop.xlane.xlu0 %1215 }
 0x1f1   :  { %v1963_v51 = vpop.eup %1962  ;;  %1767 = vmatprep.mubr.f32.mxu0 %v1961_v10 }
 0x1f2   :  { %1972 = vtanh.f32 %v627_v47  ;;  %v1701_v52 = vpop.f32.mrb[42].mxu1  ;;  %1768 = vmatmul.mubr.f32.gmra.mrb[34].mxu0 %v1963_v51 }
 0x1f3   :  { %1974 = vtanh.f32 %v632_v42  ;;  %v642_v60 = vadd.f32 %v1701_v52, %v2677_v23  ;;  %v636_v61 = vpop.f32.mrb[43].mxu1  ;;  %v1222_v42 = vpop.xlane.xlu1 %1221 }
 0x1f4   :  { %v1965_v1 = vpop.eup %1964  ;;  %v637_v2 = vadd.f32 %v2677_v23, %v636_v61  ;;  %v1219_v10 = vpop.xlane.xlu0 %1218 }
 0x1f5   :  { %v1967_v12 = vpop.eup %1966  ;;  %1770 = vmatprep.mubr.f32.mxu0 %v1965_v1 }
 0x1f6   :  { %1976 = vtanh.f32 %v637_v2  ;;  %v1704_v14 = vpop.f32.mrb[44].mxu1  ;;  %1771 = vmatmul.mubr.f32.gmra.mrb[36].mxu0 %v1967_v12  ;;  %v2752_v2 = vld [vmem:[%s3067_s6] ss:$0 sm:$0xff]  ;;  %v985_v12 = vmul.f32 %v2476_v8, %v2356_v59 }
 0x1f7   :  { %1978 = vtanh.f32 %v642_v60  ;;  %v652_v16 = vadd.f32 %v1704_v14, %v2677_v23  ;;  %v646_v56 = vpop.f32.mrb[45].mxu1 }
 0x1f8   :  { %v1969_v18 = vpop.eup %1968  ;;  %v647_v19 = vadd.f32 %v2677_v23, %v646_v56  ;;  %v1228_v51 = vpop.xlane.xlu0 %1227 }
 0x1f9   :  { %v1971_v21 = vpop.eup %1970  ;;  %1773 = vmatprep.mubr.f32.mxu0 %v1969_v18 }
 0x1fa   :  { %1980 = vtanh.f32 %v647_v19  ;;  %v1707_v22 = vpop.f32.mrb[46].mxu1  ;;  %1774 = vmatmul.mubr.f32.gmra.mrb[38].mxu0 %v1971_v21 }
 0x1fb   :  { %1982 = vtanh.f32 %v652_v16  ;;  %v662_v24 = vadd.f32 %v1707_v22, %v2677_v23  ;;  %v656_v25 = vpop.f32.mrb[47].mxu1  ;;  %v984_v16 = vmul.f32 %v2476_v8, %v2342_v54  ;;  %v986_v54 = vmul.f32 %v2476_v8, %v2351_v58 }
 0x1fc   :  { %v1973_v26 = vpop.eup %1972  ;;  %v657_v28 = vadd.f32 %v2677_v23, %v656_v25  ;;  %v1225_v23 = vpop.xlane.xlu1 %1224 }
 0x1fd   :  { %v1975_v30 = vpop.eup %1974  ;;  %1776 = vmatprep.mubr.f32.mxu0 %v1973_v26  ;;  %v2743_v60 = vpop.xlane.xlu0 %1233 }
 0x1fe   :  { %1984 = vtanh.f32 %v657_v28  ;;  %1777 = vmatmul.mubr.f32.gmra.mrb[40].mxu0 %v1975_v30 }
 0x1ff   :  { %1986 = vtanh.f32 %v662_v24  ;;  %v987_v24 = vmul.f32 %v2476_v8, %v2366_v63 }
 0x200   :  { %v1977_v3 = vpop.eup %1976  ;;  %v1231_v47 = vpop.xlane.xlu1 %1230 }
 0x201   :  { %v1979_v32 = vpop.eup %1978  ;;  %1779 = vmatprep.mubr.f32.mxu0 %v1977_v3  ;;  %v2747_v1 = vpop.xlane.xlu0 %1239 }
 0x202   :  { %1780 = vmatmul.mubr.f32.gmra.mrb[42].mxu0 %v1979_v32 }
 0x204   :  { %v1981_v33 = vpop.eup %1980  ;;  %v1237_v52 = vpop.xlane.xlu1 %1236 }
 0x205   :  { %v1983_v35 = vpop.eup %1982  ;;  %1782 = vmatprep.mubr.f32.mxu0 %v1981_v33  ;;  %v2765_v25 = vpop.xlane.xlu0 %1245  ;;  %v989_v33 = vmul.f32 %v2476_v8, %v2371_v0 }
 0x206   :  { %1783 = vmatmul.mubr.f32.gmra.mrb[44].mxu0 %v1983_v35 }
 0x208   :  { %v1985_v37 = vpop.eup %1984  ;;  %v2745_v61 = vpop.xlane.xlu1 %1242 }
 0x209   :  { %v1987_v38 = vpop.eup %1986  ;;  %1785 = vmatprep.mubr.f32.mxu0 %v1985_v37 }
 0x20a   :  { %1786 = vmatmul.mubr.f32.gmra.mrb[46].mxu0 %v1987_v38  ;;  %v988_v38 = vmul.f32 %v2476_v8, %v2382_v4 }
 0x20c   :  { %v2761_v21 = vpop.xlane.xlu1 %1248 }
 0x2a1   :  { %v1742_v14 = vpop.f32.mrb[16].mxu0 }
 0x2a2   :  { %v790_v56 = vadd.f32 %v1742_v14, %v2752_v2  ;;  %v784_v18 = vpop.f32.mrb[17].mxu0 }
 0x2a3   :  { %v785_v19 = vadd.f32 %v2752_v2, %v784_v18 }
 0x2a4   :  { %v1017_v22 = vadd.f32 %v985_v12, %v790_v56 }
 0x2a5   :  { %v1016_v59 = vadd.f32 %v984_v16, %v785_v19  ;;  %v1745_v26 = vpop.f32.mrb[18].mxu0  ;;  %v2792_v16 = vpop.xlane.xlu0 %1251 }
 0x2a6   :  { %v1312_v28 = vsel %vm1310_vm3, %v1219_v10, %v1017_v22  ;;  %v800_v30 = vadd.f32 %v1745_v26, %v2752_v2  ;;  %v794_v3 = vpop.f32.mrb[19].mxu0 }
 0x2a7   :  { %v1311_v32 = vsel %vm1310_vm3, %v1216_v43, %v1016_v59  ;;  %1344 = vst.msk [vmem:[%s3068_s7 + $0x8] sm:$0xff] %vm1213_vm1, %v1312_v28  ;;  %v795_v63 = vadd.f32 %v2752_v2, %v794_v3  ;;  %v2787_v43 = vpop.xlane.xlu1 %1254 }
 0x2a8   :  { %1343 = vst.msk [vmem:[%s3068_s7] sm:$0xff] %vm1213_vm1, %v1311_v32  ;;  %v1019_v58 = vadd.f32 %v987_v24, %v800_v30  ;;  %v992_v32 = vmul.f32 %v2476_v8, %v2428_v36  ;;  %v995_v36 = vmul.f32 %v2476_v8, %v2439_v44 }
 0x2a9   :  { %v1018_v35 = vadd.f32 %v986_v54, %v795_v63  ;;  %v1748_v37 = vpop.f32.mrb[20].mxu0 }
 0x2aa   :  { %v1314_v10 = vsel %vm1310_vm3, %v1225_v23, %v1019_v58  ;;  %v810_v12 = vadd.f32 %v1748_v37, %v2752_v2  ;;  %v804_v14 = vpop.f32.mrb[21].mxu0  ;;  %v991_v23 = vmul.f32 %v2476_v8, %v2387_v5 }
 0x2ab   :  { %v1313_v56 = vsel %vm1310_vm3, %v1222_v42, %v1018_v35  ;;  %1346 = vst.msk [vmem:[%s3068_s7 + $0x18] sm:$0xff] %vm1213_vm1, %v1314_v10  ;;  %v805_v0 = vadd.f32 %v2752_v2, %v804_v14  ;;  %v990_v42 = vmul.f32 %v2476_v8, %v2396_v11  ;;  %v1261_v54 = vpop.xlane.xlu1 %1260  ;;  %v993_v11 = vmul.f32 %v2476_v8, %v2418_v31 }
 0x2ac   :  { %1345 = vst.msk [vmem:[%s3068_s7 + $0x10] sm:$0xff] %vm1213_vm1, %v1313_v56  ;;  %v1021_v4 = vadd.f32 %v989_v33, %v810_v12 }
 0x2ad   :  { %v1020_v18 = vadd.f32 %v988_v38, %v805_v0  ;;  %v1751_v19 = vpop.f32.mrb[22].mxu0  ;;  %v994_v38 = vmul.f32 %v2476_v8, %v2450_v49 }
 0x2ae   :  { %v1316_v22 = vsel %vm1310_vm3, %v1231_v47, %v1021_v4  ;;  %v820_v24 = vadd.f32 %v1751_v19, %v2752_v2  ;;  %v814_v59 = vpop.f32.mrb[23].mxu0  ;;  %v2825_v47 = vpop.xlane.xlu0 %1257 }
 0x2af   :  { %1348 = vst.msk [vmem:[%s3068_s7 + $0x28] sm:$0xff] %vm1213_vm1, %v1316_v22  ;;  %v1315_v26 = vsel %vm1310_vm3, %v1228_v51, %v1020_v18  ;;  %v815_v5 = vadd.f32 %v2752_v2, %v814_v59  ;;  %v1267_v10 = vpop.xlane.xlu1 %1266  ;;  %v996_v18 = vmul.f32 %v2476_v8, %v2467_v6 }
 0x2b0   :  { %v1023_v28 = vadd.f32 %v991_v23, %v820_v24  ;;  %1347 = vst.msk [vmem:[%s3068_s7 + $0x20] sm:$0xff] %vm1213_vm1, %v1315_v26 }
 0x2b1   :  { %v1022_v30 = vadd.f32 %v990_v42, %v815_v5  ;;  %v1754_v3 = vpop.f32.mrb[24].mxu0 }
 0x2b2   :  { %v1318_v51 = vsel %vm1310_vm3, %v1237_v52, %v1023_v28  ;;  %v830_v63 = vadd.f32 %v1754_v3, %v2752_v2  ;;  %v824_v58 = vpop.f32.mrb[25].mxu0  ;;  %v1264_v56 = vpop.xlane.xlu0 %1263  ;;  %v998_v28 = vmul.f32 %v2476_v8, %v2484_v15  ;;  %v1001_v15 = vmul.f32 %v2476_v8, %v2509_v34 }
 0x2b3   :  { %1350 = vst.msk [vmem:[%s3068_s7 + $0x38] sm:$0xff] %vm1213_vm1, %v1318_v51  ;;  %v1317_v31 = vsel %vm1310_vm3, %v2743_v60, %v1022_v30  ;;  %v825_v33 = vadd.f32 %v2752_v2, %v824_v58  ;;  %v1273_v24 = vpop.xlane.xlu1 %1272 }
 0x2b4   :  { %v1025_v35 = vadd.f32 %v993_v11, %v830_v63  ;;  %1349 = vst.msk [vmem:[%s3068_s7 + $0x30] sm:$0xff] %vm1213_vm1, %v1317_v31  ;;  %v1000_v63 = vmul.f32 %v2476_v8, %v2516_v39 }
 0x2b5   :  { %v1024_v52 = vadd.f32 %v992_v32, %v825_v33  ;;  %v1757_v37 = vpop.f32.mrb[26].mxu0 }
 0x2b6   :  { %v1320_v60 = vsel %vm1310_vm3, %v2745_v61, %v1025_v35  ;;  %v840_v12 = vadd.f32 %v1757_v37, %v2752_v2  ;;  %v834_v14 = vpop.f32.mrb[27].mxu0  ;;  %v997_v61 = vmul.f32 %v2476_v8, %v2455_v50  ;;  %v1270_v59 = vpop.xlane.xlu0 %1269 }
 0x2b7   :  { %1352 = vst.msk [vmem:[%s3068_s7 + $0x48] sm:$0xff] %vm1213_vm1, %v1320_v60  ;;  %v1319_v44 = vsel %vm1310_vm3, %v2747_v1, %v1024_v52  ;;  %v835_v49 = vadd.f32 %v2752_v2, %v834_v14  ;;  %v1279_v58 = vpop.xlane.xlu1 %1278 }
 0x2b8   :  { %v1027_v0 = vadd.f32 %v995_v36, %v840_v12  ;;  %1351 = vst.msk [vmem:[%s3068_s7 + $0x40] sm:$0xff] %vm1213_vm1, %v1319_v44 }
 0x2b9   :  { %v1026_v4 = vadd.f32 %v994_v38, %v835_v49  ;;  %v1760_v23 = vpop.f32.mrb[28].mxu0  ;;  %v1002_v38 = vmul.f32 %v2476_v8, %v2530_v45  ;;  %v1005_v45 = vmul.f32 %v2476_v8, %v2535_v46 }
 0x2ba   :  { %v1322_v1 = vsel %vm1310_vm3, %v2761_v21, %v1027_v0  ;;  %v850_v19 = vadd.f32 %v1760_v23, %v2752_v2  ;;  %v844_v42 = vpop.f32.mrb[29].mxu0  ;;  %v999_v21 = vmul.f32 %v2476_v8, %v2472_v7  ;;  %v1276_v35 = vpop.xlane.xlu0 %1275 }
 0x2bb   :  { %1354 = vst.msk [vmem:[%s3068_s7 + $0x58] sm:$0xff] %vm1213_vm1, %v1322_v1  ;;  %v1321_v50 = vsel %vm1310_vm3, %v2765_v25, %v1026_v4  ;;  %v845_v22 = vadd.f32 %v2752_v2, %v844_v42  ;;  %v1285_v44 = vpop.xlane.xlu1 %1284  ;;  %v1004_v4 = vmul.f32 %v2476_v8, %v2550_v9  ;;  %v1007_v9 = vmul.f32 %v2476_v8, %v2559_v53 }
 0x2bc   :  { %v1029_v6 = vadd.f32 %v997_v61, %v850_v19  ;;  %1353 = vst.msk [vmem:[%s3068_s7 + $0x50] sm:$0xff] %vm1213_vm1, %v1321_v50 }
 0x2bd   :  { %v1028_v26 = vadd.f32 %v996_v18, %v845_v22  ;;  %v1763_v5 = vpop.f32.mrb[30].mxu0  ;;  %v1006_v22 = vmul.f32 %v2476_v8, %v2568_v20  ;;  %v1009_v20 = vmul.f32 %v2476_v8, %v2587_v41 }
 0x2be   :  { %v1324_v25 = vsel %vm1310_vm3, %v2787_v43, %v1029_v6  ;;  %v860_v11 = vadd.f32 %v1763_v5, %v2752_v2  ;;  %v854_v30 = vpop.f32.mrb[31].mxu0 }
 0x2bf   :  { %1356 = vst.msk [vmem:[%s3068_s7 + $0x68] sm:$0xff] %vm1213_vm1, %v1324_v25  ;;  %v1323_v7 = vsel %vm1310_vm3, %v2792_v16, %v1028_v26  ;;  %v855_v3 = vadd.f32 %v2752_v2, %v854_v30  ;;  %v1008_v30 = vmul.f32 %v2476_v8, %v2597_v48  ;;  %v1011_v48 = vmul.f32 %v2476_v8, %v2618_v17 }
 0x2c0   :  { %v1031_v32 = vadd.f32 %v999_v21, %v860_v11  ;;  %1355 = vst.msk [vmem:[%s3068_s7 + $0x60] sm:$0xff] %vm1213_vm1, %v1323_v7 }
 0x2c1   :  { %v1030_v43 = vadd.f32 %v998_v28, %v855_v3  ;;  %v1766_v51 = vpop.f32.mrb[32].mxu0 }
 0x2c2   :  { %v1326_v16 = vsel %vm1310_vm3, %v1261_v54, %v1031_v32  ;;  %v870_v31 = vadd.f32 %v1766_v51, %v2752_v2  ;;  %v864_v33 = vpop.f32.mrb[33].mxu0  ;;  %v1003_v54 = vmul.f32 %v2476_v8, %v2521_v40 }
 0x2c3   :  { %1358 = vst.msk [vmem:[%s3068_s7 + $0x78] sm:$0xff] %vm1213_vm1, %v1326_v16  ;;  %v1325_v34 = vsel %vm1310_vm3, %v2825_v47, %v1030_v43  ;;  %v865_v36 = vadd.f32 %v2752_v2, %v864_v33 }
 0x2c4   :  { %v1033_v39 = vadd.f32 %v1001_v15, %v870_v31  ;;  %1357 = vst.msk [vmem:[%s3068_s7 + $0x70] sm:$0xff] %vm1213_vm1, %v1325_v34  ;;  %v1010_v31 = vmul.f32 %v2476_v8, %v2611_v13  ;;  %v1013_v13 = vmul.f32 %v2476_v8, %v2632_v27 }
 0x2c5   :  { %v1032_v52 = vadd.f32 %v1000_v63, %v865_v36  ;;  %v1769_v37 = vpop.f32.mrb[34].mxu0 }
 0x2c6   :  { %v1328_v60 = vsel %vm1310_vm3, %v1267_v10, %v1033_v39  ;;  %v880_v47 = vadd.f32 %v1769_v37, %v2752_v2  ;;  %v874_v12 = vpop.f32.mrb[35].mxu0  ;;  %v1282_v10 = vpop.xlane.xlu0 %1281  ;;  %v1012_v37 = vmul.f32 %v2476_v8, %v2638_v29  ;;  %v1015_v29 = vmul.f32 %v2476_v8, %v2663_v62 }
 0x2c7   :  { %1360 = vst.msk [vmem:[%s3068_s7 + $0x88] sm:$0xff] %vm1213_vm1, %v1328_v60  ;;  %v1327_v14 = vsel %vm1310_vm3, %v1264_v56, %v1032_v52  ;;  %v875_v40 = vadd.f32 %v2752_v2, %v874_v12 }
 0x2c8   :  { %v1035_v49 = vadd.f32 %v1003_v54, %v880_v47  ;;  %1359 = vst.msk [vmem:[%s3068_s7 + $0x80] sm:$0xff] %vm1213_vm1, %v1327_v14 }
 0x2c9   :  { %v1034_v0 = vadd.f32 %v1002_v38, %v875_v40  ;;  %v1772_v61 = vpop.f32.mrb[36].mxu0 }
 0x2ca   :  { %v1330_v56 = vsel %vm1310_vm3, %v1273_v24, %v1035_v49  ;;  %v890_v23 = vadd.f32 %v1772_v61, %v2752_v2  ;;  %v884_v18 = vpop.f32.mrb[37].mxu0  ;;  %v1291_v24 = vpop.xlane.xlu1 %1290 }
 0x2cb   :  { %1362 = vst.msk [vmem:[%s3068_s7 + $0x98] sm:$0xff] %vm1213_vm1, %v1330_v56  ;;  %v1329_v46 = vsel %vm1310_vm3, %v1270_v59, %v1034_v0  ;;  %v885_v1 = vadd.f32 %v2752_v2, %v884_v18  ;;  %v1288_v26 = vpop.xlane.xlu0 %1287 }
 0x2cc   :  { %v1037_v19 = vadd.f32 %v1005_v45, %v890_v23  ;;  %1361 = vst.msk [vmem:[%s3068_s7 + $0x90] sm:$0xff] %vm1213_vm1, %v1329_v46 }
 0x2cd   :  { %v1036_v42 = vadd.f32 %v1004_v4, %v885_v1  ;;  %v1775_v50 = vpop.f32.mrb[38].mxu0 }
 0x2ce   :  { %v1332_v6 = vsel %vm1310_vm3, %v1279_v58, %v1037_v19  ;;  %v900_v21 = vadd.f32 %v1775_v50, %v2752_v2  ;;  %v894_v59 = vpop.f32.mrb[39].mxu0  ;;  %v1297_v43 = vpop.xlane.xlu1 %1296 }
 0x2cf   :  { %1364 = vst.msk [vmem:[%s3068_s7 + $0xa8] sm:$0xff] %vm1213_vm1, %v1332_v6  ;;  %v1331_v53 = vsel %vm1310_vm3, %v1276_v35, %v1036_v42  ;;  %v895_v5 = vadd.f32 %v2752_v2, %v894_v59  ;;  %v1294_v63 = vpop.xlane.xlu0 %1293 }
 0x2d0   :  { %v1039_v28 = vadd.f32 %v1007_v9, %v900_v21  ;;  %1363 = vst.msk [vmem:[%s3068_s7 + $0xa0] sm:$0xff] %vm1213_vm1, %v1331_v53 }
 0x2d1   :  { %v1038_v25 = vadd.f32 %v1006_v22, %v895_v5  ;;  %v1778_v11 = vpop.f32.mrb[40].mxu0 }
 0x2d2   :  { %v1334_v7 = vsel %vm1310_vm3, %v1285_v44, %v1039_v28  ;;  %v910_v3 = vadd.f32 %v1778_v11, %v2752_v2  ;;  %v904_v32 = vpop.f32.mrb[41].mxu0  ;;  %v1303_v38 = vpop.xlane.xlu1 %1302 }
 0x2d3   :  { %1366 = vst.msk [vmem:[%s3068_s7 + $0xb8] sm:$0xff] %vm1213_vm1, %v1334_v7  ;;  %v1333_v15 = vsel %vm1310_vm3, %v1282_v10, %v1038_v25  ;;  %v905_v41 = vadd.f32 %v2752_v2, %v904_v32  ;;  %v1300_v14 = vpop.xlane.xlu0 %1299  ;;  %v1014_v10 = vmul.f32 %v2476_v8, %v2655_v57 }
 0x2d4   :  { %v1041_v51 = vadd.f32 %v1009_v20, %v910_v3  ;;  %1365 = vst.msk [vmem:[%s3068_s7 + $0xb0] sm:$0xff] %vm1213_vm1, %v1333_v15 }
 0x2d5   :  { %v1040_v58 = vadd.f32 %v1008_v30, %v905_v41  ;;  %v1781_v16 = vpop.f32.mrb[42].mxu0 }
 0x2d6   :  { %v1336_v33 = vsel %vm1310_vm3, %v1291_v24, %v1041_v51  ;;  %v920_v35 = vadd.f32 %v1781_v16, %v2752_v2  ;;  %v914_v34 = vpop.f32.mrb[43].mxu0  ;;  %v1309_v23 = vpop.xlane.xlu1 %1308 }
 0x2d7   :  { %1368 = vst.msk [vmem:[%s3068_s7 + $0xc8] sm:$0xff] %vm1213_vm1, %v1336_v33  ;;  %v1335_v17 = vsel %vm1310_vm3, %v1288_v26, %v1040_v58  ;;  %v915_v36 = vadd.f32 %v2752_v2, %v914_v34  ;;  %v1306_v8 = vpop.xlane.xlu0 %1305 }
 0x2d8   :  { %v1043_v39 = vadd.f32 %v1011_v48, %v920_v35  ;;  %1367 = vst.msk [vmem:[%s3068_s7 + $0xc0] sm:$0xff] %vm1213_vm1, %v1335_v17 }
 0x2d9   :  { %v1042_v54 = vadd.f32 %v1010_v31, %v915_v36  ;;  %v1784_v52 = vpop.f32.mrb[44].mxu0 }
 0x2da   :  { %v1338_v60 = vsel %vm1310_vm3, %v1297_v43, %v1043_v39  ;;  %v930_v47 = vadd.f32 %v1784_v52, %v2752_v2  ;;  %v924_v12 = vpop.f32.mrb[45].mxu0 }
 0x2db   :  { %1370 = vst.msk [vmem:[%s3068_s7 + $0xd8] sm:$0xff] %vm1213_vm1, %v1338_v60  ;;  %v1337_v27 = vsel %vm1310_vm3, %v1294_v63, %v1042_v54  ;;  %v925_v40 = vadd.f32 %v2752_v2, %v924_v12 }
 0x2dc   :  { %v1045_v44 = vadd.f32 %v1013_v13, %v930_v47  ;;  %1369 = vst.msk [vmem:[%s3068_s7 + $0xd0] sm:$0xff] %vm1213_vm1, %v1337_v27 }
 0x2dd   :  { %v1044_v49 = vadd.f32 %v1012_v37, %v925_v40  ;;  %v1787_v45 = vpop.f32.mrb[46].mxu0 }
 0x2de   :  { %v1340_v0 = vsel %vm1310_vm3, %v1303_v38, %v1045_v44  ;;  %v940_v61 = vadd.f32 %v1787_v45, %v2752_v2  ;;  %v934_v4 = vpop.f32.mrb[47].mxu0 }
 0x2df   :  { %1372 = vst.msk [vmem:[%s3068_s7 + $0xe8] sm:$0xff] %vm1213_vm1, %v1340_v0  ;;  %v1339_v56 = vsel %vm1310_vm3, %v1300_v14, %v1044_v49  ;;  %v935_v62 = vadd.f32 %v2752_v2, %v934_v4 }
 0x2e0   :  { %v1047_v18 = vadd.f32 %v1015_v29, %v940_v61  ;;  %1371 = vst.msk [vmem:[%s3068_s7 + $0xe0] sm:$0xff] %vm1213_vm1, %v1339_v56 }
 0x2e1   :  { %v1046_v57 = vadd.f32 %v1014_v10, %v935_v62 }
 0x2e2   :  { %v1342_v46 = vsel %vm1310_vm3, %v1309_v23, %v1047_v18 }
 0x2e3   :  { %1374 = vst.msk [vmem:[%s3068_s7 + $0xf8] sm:$0xff] %vm1213_vm1, %v1342_v46  ;;  %v1341_v2 = vsel %vm1310_vm3, %v1306_v8, %v1046_v57 }
 0x2e4   :  { %1373 = vst.msk [vmem:[%s3068_s7 + $0xf0] sm:$0xff] %vm1213_vm1, %v1341_v2 }

</bundles_post_ra>
